<compile_context>
chip_gen: v7x
topology: tpu7x:2x2x1
jax: 0.10.0
libtpu: 0.0.40
codegen_flags: <defaults>
</compile_context>

<pallas_src>
import functools

import jax
import jax.numpy as jnp
from jax.experimental import pallas as pl
from jax.experimental.pallas import tpu as pltpu


# ----------------------------------------------------------------------------
# Fused per-level kernel: 1x1 conv (+ top-down add) + 3x3 conv
# ----------------------------------------------------------------------------

def _fpn_level_kernel(*refs, fy, has_td, emit_inner, compute_dtype):
    it = iter(refs)
    x_ref = next(it)          # (nb, H, W, Cin)
    w1_ref = next(it)         # (Cin, C)
    b1_ref = next(it)         # (1, C)
    w3f_ref = next(it)        # (3, 3C, C)   rows ordered [dx, cin] per dy
    b3_ref = next(it)         # (1, C)
    td_ref = next(it) if has_td else None
    inner_ref = next(it) if emit_inner else None
    res_ref = next(it)

    nb, h, w, cin = x_ref.shape
    c = w1_ref.shape[1]
    cd = compute_dtype
    m = nb * h                # only major dims are merged -> free relabels

    # ---- 1x1 lateral conv on the MXU (f32 accumulation) --------------------
    x3 = x_ref[...].astype(cd).reshape(m, w, cin)
    inner = jax.lax.dot_general(
        x3, w1_ref[...],
        dimension_numbers=(((2,), (0,)), ((), ())),
        preferred_element_type=jnp.float32)                       # (m, W, C)
    inner = inner + b1_ref[...]

    # ---- fused nearest-neighbour top-down merge (H repeat in-kernel) -------
    if has_td:
        td = td_ref[...]                                          # (nb, th, W, C) f32
        if fy > 1:
            th = td.shape[1]
            td = jnp.broadcast_to(td[:, :, None, :, :], (nb, th, fy, w, c))
        inner = inner + td.reshape(m, w, c)

    if emit_inner:
        # store early so the last_inner writeback DMA overlaps the 3x3 work
        inner_ref[...] = inner.reshape(nb, h, w, c).astype(inner_ref.dtype)

    # ---- 3x3 conv (padding=1) fused in the same kernel ----------------------
    # Lane-concat the three W taps into a (.., 3C) slab, pad H with zero rows,
    # then 3 MXU matmuls (one per dy, K = 3C) accumulated in a local value.
    ic = inner.astype(cd).reshape(nb, h, w, c)
    zc = jnp.zeros((nb, h, 1, c), cd)
    left = jnp.concatenate([zc, ic[:, :, :-1, :]], axis=2)        # tap x-1
    right = jnp.concatenate([ic[:, :, 1:, :], zc], axis=2)        # tap x+1
    # TODO(synk): generate the two W shifts with pltpu.roll (XLU) once roll on
    # the second-minor axis is load-bearing here; concat is the safe fallback.
    slab = jnp.concatenate([left, ic, right], axis=3)             # (nb, H, W, 3C)
    zr = jnp.zeros((nb, 1, w, 3 * c), cd)
    slab = jnp.concatenate([zr, slab, zr], axis=1)                # (nb, H+2, W, 3C)

    acc = None
    for dy in range(3):
        tap = slab[:, dy:dy + h].reshape(m, w, 3 * c)             # free dy shift
        part = jax.lax.dot_general(
            tap, w3f_ref[dy],
            dimension_numbers=(((2,), (0,)), ((), ())),
            preferred_element_type=jnp.float32)
        acc = part if acc is None else acc + part
    acc = acc + b3_ref[...]                                       # epilogue bias
    res_ref[...] = acc.reshape(nb, h, w, c).astype(res_ref.dtype)


# ----------------------------------------------------------------------------
# Per-chip VMEM limit (v5e scoped default is 16 MiB; v7x physical is 64 MiB)
# ----------------------------------------------------------------------------

def _vmem_limit_bytes(est_bytes):
    cap = 128 * 1024 * 1024
    try:
        cap = int(getattr(pltpu.get_tpu_info(), "vmem_capacity_bytes", cap))
    except Exception:
        pass
    ceiling = (3 * cap) // 4                 # headroom below physical VMEM
    floor = min(32 * 1024 * 1024, ceiling)
    return int(min(max(est_bytes, floor), ceiling))


# ----------------------------------------------------------------------------
# Wrapper for one pyramid level
# ----------------------------------------------------------------------------

def fpn_level(x_nhwc, w1_oihw, b1, w3_oihw, b3, td, *,
              emit_inner=True, compute_dtype=jnp.bfloat16,
              out_dtype=jnp.float32):
    """One fused FPN level.

    x_nhwc : (N, H, W, Cin) input feature map.
    td     : coarser `last_inner` (N, Hc, Wc, Cout) NHWC, or None (top level).
    Returns (last_inner | None, result); last_inner is f32, result is out_dtype.
    """
    n, h, w, cin = x_nhwc.shape
    cout = w1_oihw.shape[0]

    # weight prep (tiny, once per call in XLA)
    wk1 = jnp.transpose(w1_oihw[:, :, 0, 0], (1, 0)).astype(compute_dtype)     # (Cin, C)
    # (O, I, 3, 3) -> (kh, kw, I, O) -> (kh, kw*I, O): row index = dx*C + cin
    w3f = jnp.transpose(w3_oihw, (2, 3, 1, 0)).reshape(3, 3 * cout, cout)
    w3f = w3f.astype(compute_dtype)
    b1r = b1.reshape(1, cout).astype(jnp.float32)
    b3r = b3.reshape(1, cout).astype(jnp.float32)

    # Small coarse levels: fold the whole batch into one block so M = N*H*W
    # fills the MXU; large levels keep per-item blocks (batch axis "parallel").
    nb = n if (h * w < 1024) else 1
    grid = (n // nb,)

    has_td = td is not None
    fy = 1
    th = 0
    td_in = None
    if has_td:
        hc, wc = td.shape[1], td.shape[2]
        wi = (jnp.arange(w) * wc) // w                   # nearest (floor) cols
        if h % hc == 0 and w % wc == 0:
            fy = h // hc
            th = hc
            # TODO(synk): move this W-axis nearest repeat into the kernel too
            # (pass the raw (N, Hc, Wc, C) block) to drop its HBM round trip.
            td_in = td[:, :, wi, :]                      # (N, Hc, W, C)
        else:
            hi = (jnp.arange(h) * hc) // h               # general fallback
            th = h
            td_in = td[:, hi][:, :, wi]                  # (N, H, W, C)

    inputs = [x_nhwc, wk1, b1r, w3f, b3r]
    in_specs = [
        pl.BlockSpec((nb, h, w, cin), lambda i: (i, 0, 0, 0)),
        pl.BlockSpec((cin, cout), lambda i: (0, 0)),
        pl.BlockSpec((1, cout), lambda i: (0, 0)),
        pl.BlockSpec((3, 3 * cout, cout), lambda i: (0, 0, 0)),
        pl.BlockSpec((1, cout), lambda i: (0, 0)),
    ]
    if has_td:
        inputs.append(td_in)
        in_specs.append(pl.BlockSpec((nb, th, w, cout), lambda i: (i, 0, 0, 0)))

    res_spec = pl.BlockSpec((nb, h, w, cout), lambda i: (i, 0, 0, 0))
    res_sds = jax.ShapeDtypeStruct((n, h, w, cout), out_dtype)
    if emit_inner:
        # last_inner stays f32: it feeds the next (finer) level's merge.
        out_shape = (jax.ShapeDtypeStruct((n, h, w, cout), jnp.float32), res_sds)
        out_specs = (pl.BlockSpec((nb, h, w, cout), lambda i: (i, 0, 0, 0)), res_spec)
    else:
        out_shape = res_sds
        out_specs = res_spec

    # conservative per-step footprint estimate (blocks double-buffered + temps)
    cd_sz = jnp.dtype(compute_dtype).itemsize
    out_sz = jnp.dtype(out_dtype).itemsize
    blk_in = (nb * h * w * cin * 4 + (nb * th * w * cout * 4 if has_td else 0)
              + cin * cout * cd_sz + 9 * cout * cout * cd_sz + 2 * cout * 4)
    blk_out = nb * h * w * cout * ((4 if emit_inner else 0) + out_sz)
    temps = (nb * h * w * cout * (2 * 4 + 4 * cd_sz)
             + nb * (h + 2) * w * 3 * cout * cd_sz)
    est = 2 * (blk_in + blk_out) + temps + (2 << 20)

    kernel = functools.partial(_fpn_level_kernel, fy=fy, has_td=has_td,
                               emit_inner=emit_inner, compute_dtype=compute_dtype)

    out = pl.pallas_call(
        kernel,
        out_shape=out_shape,
        grid=grid,
        in_specs=in_specs,
        out_specs=out_specs,
        compiler_params=pltpu.CompilerParams(
            dimension_semantics=("parallel",),           # megacore batch sharding
            vmem_limit_bytes=_vmem_limit_bytes(est)),
    )(*inputs)

    if emit_inner:
        last_inner, result = out
        return last_inner, result
    return None, out


# ----------------------------------------------------------------------------
# FPN forward (semantics of CustomFPN.forward)
# ----------------------------------------------------------------------------

def fpn_forward_nhwc(feats_nhwc, params, compute_dtype=jnp.bfloat16,
                     out_dtype=jnp.float32):
    """feats_nhwc: list of NHWC feature maps, fine -> coarse."""
    inner_w, inner_b, layer_w, layer_b = params
    num = len(feats_nhwc)

    last_inner, res = fpn_level(
        feats_nhwc[-1], inner_w[-1], inner_b[-1], layer_w[-1], layer_b[-1],
        td=None, emit_inner=(num > 1),
        compute_dtype=compute_dtype, out_dtype=out_dtype)
    results = [res]
    for idx in range(num - 2, -1, -1):
        last_inner, res = fpn_level(
            feats_nhwc[idx], inner_w[idx], inner_b[idx],
            layer_w[idx], layer_b[idx],
            td=last_inner, emit_inner=(idx > 0),          # finest level: no dead output
            compute_dtype=compute_dtype, out_dtype=out_dtype)
        results.insert(0, res)
    return results


def fpn_forward(feats_nchw, params, compute_dtype=jnp.bfloat16,
                out_dtype=jnp.float32):
    """NCHW (PyTorch-layout) wrapper around the NHWC pipeline."""
    # TODO(synk): production callers should use fpn_forward_nhwc directly and
    # keep the whole model channels-last to avoid these boundary transposes.
    xs = [jnp.transpose(f, (0, 2, 3, 1)) for f in feats_nchw]
    results = fpn_forward_nhwc(xs, params, compute_dtype=compute_dtype,
                               out_dtype=out_dtype)
    return {str(i): jnp.transpose(v, (0, 3, 1, 2)) for i, v in enumerate(results)}


# ----------------------------------------------------------------------------
# Pure-JAX reference (lax.conv) for correctness checking
# ----------------------------------------------------------------------------

def ref_forward(feats_nchw, params):
    inner_w, inner_b, layer_w, layer_b = params

    def conv(x, w, b, pad):
        y = jax.lax.conv_general_dilated(
            x, w, window_strides=(1, 1),
            padding=[(pad, pad), (pad, pad)],
            dimension_numbers=('NCHW', 'OIHW', 'NCHW'))
        return y + b[None, :, None, None]

    num = len(feats_nchw)
    last = conv(feats_nchw[-1], inner_w[-1], inner_b[-1], 0)
    results = [conv(last, layer_w[-1], layer_b[-1], 1)]
    for idx in range(num - 2, -1, -1):
        lat = conv(feats_nchw[idx], inner_w[idx], inner_b[idx], 0)
        oh, ow = lat.shape[-2:]
        hc, wc = last.shape[-2:]
        hi = (jnp.arange(oh) * hc) // oh
        wi = (jnp.arange(ow) * wc) // ow
        td = last[:, :, hi][:, :, :, wi]
        last = lat + td
        results.insert(0, conv(last, layer_w[idx], layer_b[idx], 1))
    return {str(i): v for i, v in enumerate(results)}


# ----------------------------------------------------------------------------
# Deterministic parameter init (shapes follow nn.Conv2d in __init__)
# ----------------------------------------------------------------------------

def init_params(key, in_channels_list, out_channels):
    inner_w, inner_b, layer_w, layer_b = [], [], [], []
    for cin in in_channels_list:
        key, k1, k2, k3, k4 = jax.random.split(key, 5)
        inner_w.append(0.05 * jax.random.normal(k1, (out_channels, cin, 1, 1), jnp.float32))
        inner_b.append(0.05 * jax.random.normal(k2, (out_channels,), jnp.float32))
        layer_w.append(0.05 * jax.random.normal(k3, (out_channels, out_channels, 3, 3), jnp.float32))
        layer_b.append(0.05 * jax.random.normal(k4, (out_channels,), jnp.float32))
    return inner_w, inner_b, layer_w, layer_b


if __name__ == "__main__":
    key = jax.random.PRNGKey(0)
    # lane-dense config: out_channels = 128 (module default is 256)
    in_channels_list = [32, 64, 128]
    out_channels = 128

    kp, kx0, kx1, kx2 = jax.random.split(key, 4)
    params = init_params(kp, in_channels_list, out_channels)

    # pyramid of feature maps (NCHW), fine -> coarse
    feats = [
        jax.random.normal(kx0, (2, 32, 32, 32), jnp.float32),
        jax.random.normal(kx1, (2, 64, 16, 16), jnp.float32),
        jax.random.normal(kx2, (2, 128, 8, 8), jnp.float32),
    ]

    ref = ref_forward(feats, params)

    # f32 compute path: tight check against the lax.conv reference
    out = jax.block_until_ready(
        fpn_forward(feats, params, compute_dtype=jnp.float32, out_dtype=jnp.float32))
    for k in sorted(out.keys()):
        assert out[k].shape == ref[k].shape, (k, out[k].shape, ref[k].shape)
        assert jnp.allclose(out[k], ref[k], atol=1e-3, rtol=1e-3), f"f32 mismatch at level {k}"

    # default path: bf16 matmul operands (f32 accumulation / f32 outputs)
    out_bf16 = jax.block_until_ready(fpn_forward(feats, params))
    for k in sorted(out_bf16.keys()):
        assert out_bf16[k].shape == ref[k].shape
        assert jnp.allclose(out_bf16[k], ref[k], atol=0.3, rtol=0.05), \
            f"bf16 mismatch at level {k}"

    print("KERNEL_OK")
</pallas_src>

<mosaic_0001>
module attributes {stable_mosaic.version = 11 : i64} {
  func.func @_fpn_level_kernel(%arg0: i32, %arg1: memref<2x8x8x128xf32, #tpu.memory_space<vmem>>, %arg2: memref<128x128xf32, #tpu.memory_space<vmem>>, %arg3: memref<1x128xf32, #tpu.memory_space<vmem>>, %arg4: memref<3x384x128xf32, #tpu.memory_space<vmem>>, %arg5: memref<1x128xf32, #tpu.memory_space<vmem>>, %arg6: memref<2x8x8x128xf32, #tpu.memory_space<vmem>>, %arg7: memref<2x8x8x128xf32, #tpu.memory_space<vmem>>) attributes {dimension_semantics = [#tpu.dimension_semantics<parallel>], iteration_bounds = array<i64: 1>, scalar_prefetch = 0 : i64, scratch_operands = 0 : i64, tpu.core_type = #tpu.core_type<tc>, window_params = [{transform_indices = @transform_0, window_bounds = array<i64: 2, 8, 8, 128>}, {pipeline_mode = #tpu.pipeline_mode<synchronous>, transform_indices = @transform_1, window_bounds = array<i64: 128, 128>}, {pipeline_mode = #tpu.pipeline_mode<synchronous>, transform_indices = @transform_2, window_bounds = array<i64: 1, 128>}, {pipeline_mode = #tpu.pipeline_mode<synchronous>, transform_indices = @transform_3, window_bounds = array<i64: 3, 384, 128>}, {pipeline_mode = #tpu.pipeline_mode<synchronous>, transform_indices = @transform_4, window_bounds = array<i64: 1, 128>}, {transform_indices = @transform_5, window_bounds = array<i64: 2, 8, 8, 128>}, {transform_indices = @transform_6, window_bounds = array<i64: 2, 8, 8, 128>}]} {
    %c0 = arith.constant 0 : index
    %c0_0 = arith.constant 0 : index
    %c0_1 = arith.constant 0 : index
    %c0_2 = arith.constant 0 : index
    %0 = vector.load %arg1[%c0, %c0_0, %c0_1, %c0_2] : memref<2x8x8x128xf32, #tpu.memory_space<vmem>>, vector<2x8x8x128xf32>
    %1 = vector.shape_cast %0 : vector<2x8x8x128xf32> to vector<16x8x128xf32>
    %c0_3 = arith.constant 0 : index
    %c0_4 = arith.constant 0 : index
    %2 = vector.load %arg2[%c0_3, %c0_4] : memref<128x128xf32, #tpu.memory_space<vmem>>, vector<128x128xf32>
    %cst = arith.constant dense<0.000000e+00> : vector<16x8x128xf32>
    %3 = tpu.matmul %1, %2, %cst {dimension_numbers = #tpu.dot_dimension_numbers<[2], [0], [0, 1], [1], [0, 0, 0, 1, 1, 1], [], []>} : vector<16x8x128xf32>, vector<128x128xf32>, vector<16x8x128xf32> -> vector<16x8x128xf32>
    %c0_5 = arith.constant 0 : index
    %c0_6 = arith.constant 0 : index
    %4 = vector.load %arg3[%c0_5, %c0_6] : memref<1x128xf32, #tpu.memory_space<vmem>>, vector<1x128xf32>
    %5 = vector.shape_cast %4 : vector<1x128xf32> to vector<1x1x128xf32>
    %6 = vector.broadcast %5 : vector<1x1x128xf32> to vector<16x8x128xf32>
    %7 = arith.addf %3, %6 : vector<16x8x128xf32>
    %8 = vector.shape_cast %7 : vector<16x8x128xf32> to vector<2x8x8x128xf32>
    %c0_7 = arith.constant 0 : index
    %c0_8 = arith.constant 0 : index
    %c0_9 = arith.constant 0 : index
    %c0_10 = arith.constant 0 : index
    %9 = vector.load %arg6[%c0_7, %c0_8, %c0_9, %c0_10] : memref<2x8x8x128xf32, #tpu.memory_space<vmem>>, vector<2x8x8x128xf32>
    tpu.vector_store %arg6[%c0_7, %c0_8, %c0_9, %c0_10], %8 {strides = array<i32>} : memref<2x8x8x128xf32, #tpu.memory_space<vmem>>, vector<2x8x8x128xf32>,
    %10 = vector.shape_cast %7 : vector<16x8x128xf32> to vector<2x8x8x128xf32>
    %cst_11 = arith.constant 0.000000e+00 : f32
    %11 = vector.broadcast %cst_11 : f32 to vector<2x8x1x128xf32>
    %12 = vector.extract_strided_slice %10 {offsets = [0, 0, 0, 0], sizes = [2, 8, 7, 128], strides = [1, 1, 1, 1]} : vector<2x8x8x128xf32> to vector<2x8x7x128xf32>
    %13 = tpu.concatenate %11, %12 in 2 : vector<2x8x1x128xf32>, vector<2x8x7x128xf32> -> vector<2x8x8x128xf32>
    %14 = vector.extract_strided_slice %10 {offsets = [0, 0, 1, 0], sizes = [2, 8, 7, 128], strides = [1, 1, 1, 1]} : vector<2x8x8x128xf32> to vector<2x8x7x128xf32>
    %15 = tpu.concatenate %14, %11 in 2 : vector<2x8x7x128xf32>, vector<2x8x1x128xf32> -> vector<2x8x8x128xf32>
    %16 = tpu.concatenate %13, %10, %15 in 3 : vector<2x8x8x128xf32>, vector<2x8x8x128xf32>, vector<2x8x8x128xf32> -> vector<2x8x8x384xf32>
    %cst_12 = arith.constant 0.000000e+00 : f32
    %17 = vector.broadcast %cst_12 : f32 to vector<2x1x8x384xf32>
    %18 = tpu.concatenate %17, %16, %17 in 1 : vector<2x1x8x384xf32>, vector<2x8x8x384xf32>, vector<2x1x8x384xf32> -> vector<2x10x8x384xf32>
    %19 = vector.extract_strided_slice %18 {offsets = [0, 0, 0, 0], sizes = [2, 8, 8, 384], strides = [1, 1, 1, 1]} : vector<2x10x8x384xf32> to vector<2x8x8x384xf32>
    %20 = vector.shape_cast %19 : vector<2x8x8x384xf32> to vector<16x8x384xf32>
    %c0_13 = arith.constant 0 : index
    %c0_14 = arith.constant 0 : index
    %c0_15 = arith.constant 0 : index
    %21 = vector.load %arg4[%c0_13, %c0_14, %c0_15] : memref<3x384x128xf32, #tpu.memory_space<vmem>>, vector<1x384x128xf32>
    %22 = vector.shape_cast %21 : vector<1x384x128xf32> to vector<384x128xf32>
    %cst_16 = arith.constant dense<0.000000e+00> : vector<16x8x128xf32>
    %23 = tpu.matmul %20, %22, %cst_16 {dimension_numbers = #tpu.dot_dimension_numbers<[2], [0], [0, 1], [1], [0, 0, 0, 1, 1, 1], [], []>} : vector<16x8x384xf32>, vector<384x128xf32>, vector<16x8x128xf32> -> vector<16x8x128xf32>
    %24 = vector.extract_strided_slice %18 {offsets = [0, 1, 0, 0], sizes = [2, 8, 8, 384], strides = [1, 1, 1, 1]} : vector<2x10x8x384xf32> to vector<2x8x8x384xf32>
    %25 = vector.shape_cast %24 : vector<2x8x8x384xf32> to vector<16x8x384xf32>
    %c1 = arith.constant 1 : index
    %c0_17 = arith.constant 0 : index
    %c0_18 = arith.constant 0 : index
    %26 = vector.load %arg4[%c1, %c0_17, %c0_18] : memref<3x384x128xf32, #tpu.memory_space<vmem>>, vector<1x384x128xf32>
    %27 = vector.shape_cast %26 : vector<1x384x128xf32> to vector<384x128xf32>
    %cst_19 = arith.constant dense<0.000000e+00> : vector<16x8x128xf32>
    %28 = tpu.matmul %25, %27, %cst_19 {dimension_numbers = #tpu.dot_dimension_numbers<[2], [0], [0, 1], [1], [0, 0, 0, 1, 1, 1], [], []>} : vector<16x8x384xf32>, vector<384x128xf32>, vector<16x8x128xf32> -> vector<16x8x128xf32>
    %29 = arith.addf %23, %28 : vector<16x8x128xf32>
    %30 = vector.extract_strided_slice %18 {offsets = [0, 2, 0, 0], sizes = [2, 8, 8, 384], strides = [1, 1, 1, 1]} : vector<2x10x8x384xf32> to vector<2x8x8x384xf32>
    %31 = vector.shape_cast %30 : vector<2x8x8x384xf32> to vector<16x8x384xf32>
    %c2 = arith.constant 2 : index
    %c0_20 = arith.constant 0 : index
    %c0_21 = arith.constant 0 : index
    %32 = vector.load %arg4[%c2, %c0_20, %c0_21] : memref<3x384x128xf32, #tpu.memory_space<vmem>>, vector<1x384x128xf32>
    %33 = vector.shape_cast %32 : vector<1x384x128xf32> to vector<384x128xf32>
    %cst_22 = arith.constant dense<0.000000e+00> : vector<16x8x128xf32>
    %34 = tpu.matmul %31, %33, %cst_22 {dimension_numbers = #tpu.dot_dimension_numbers<[2], [0], [0, 1], [1], [0, 0, 0, 1, 1, 1], [], []>} : vector<16x8x384xf32>, vector<384x128xf32>, vector<16x8x128xf32> -> vector<16x8x128xf32>
    %35 = arith.addf %29, %34 : vector<16x8x128xf32>
    %c0_23 = arith.constant 0 : index
    %c0_24 = arith.constant 0 : index
    %36 = vector.load %arg5[%c0_23, %c0_24] : memref<1x128xf32, #tpu.memory_space<vmem>>, vector<1x128xf32>
    %37 = vector.shape_cast %36 : vector<1x128xf32> to vector<1x1x128xf32>
    %38 = vector.broadcast %37 : vector<1x1x128xf32> to vector<16x8x128xf32>
    %39 = arith.addf %35, %38 : vector<16x8x128xf32>
    %40 = vector.shape_cast %39 : vector<16x8x128xf32> to vector<2x8x8x128xf32>
    %c0_25 = arith.constant 0 : index
    %c0_26 = arith.constant 0 : index
    %c0_27 = arith.constant 0 : index
    %c0_28 = arith.constant 0 : index
    %41 = vector.load %arg7[%c0_25, %c0_26, %c0_27, %c0_28] : memref<2x8x8x128xf32, #tpu.memory_space<vmem>>, vector<2x8x8x128xf32>
    tpu.vector_store %arg7[%c0_25, %c0_26, %c0_27, %c0_28], %40 {strides = array<i32>} : memref<2x8x8x128xf32, #tpu.memory_space<vmem>>, vector<2x8x8x128xf32>,
    return
  }
  func.func @transform_0(%arg0: i32) -> (i32, i32, i32, i32) {
    %c0_i32 = arith.constant 0 : i32
    %c0_i32_0 = arith.constant 0 : i32
    %c0_i32_1 = arith.constant 0 : i32
    %c0_i32_2 = arith.constant 0 : i32
    return %arg0, %c0_i32, %c0_i32_0, %c0_i32_1 : i32, i32, i32, i32
  }
  func.func @transform_1(%arg0: i32) -> (i32, i32) {
    %c0_i32 = arith.constant 0 : i32
    %c0_i32_0 = arith.constant 0 : i32
    %c0_i32_1 = arith.constant 0 : i32
    return %c0_i32, %c0_i32_0 : i32, i32
  }
  func.func @transform_2(%arg0: i32) -> (i32, i32) {
    %c0_i32 = arith.constant 0 : i32
    %c0_i32_0 = arith.constant 0 : i32
    %c0_i32_1 = arith.constant 0 : i32
    return %c0_i32, %c0_i32_0 : i32, i32
  }
  func.func @transform_3(%arg0: i32) -> (i32, i32, i32) {
    %c0_i32 = arith.constant 0 : i32
    %c0_i32_0 = arith.constant 0 : i32
    %c0_i32_1 = arith.constant 0 : i32
    %c0_i32_2 = arith.constant 0 : i32
    return %c0_i32, %c0_i32_0, %c0_i32_1 : i32, i32, i32
  }
  func.func @transform_4(%arg0: i32) -> (i32, i32) {
    %c0_i32 = arith.constant 0 : i32
    %c0_i32_0 = arith.constant 0 : i32
    %c0_i32_1 = arith.constant 0 : i32
    return %c0_i32, %c0_i32_0 : i32, i32
  }
  func.func @transform_5(%arg0: i32) -> (i32, i32, i32, i32) {
    %c0_i32 = arith.constant 0 : i32
    %c0_i32_0 = arith.constant 0 : i32
    %c0_i32_1 = arith.constant 0 : i32
    %c0_i32_2 = arith.constant 0 : i32
    return %arg0, %c0_i32, %c0_i32_0, %c0_i32_1 : i32, i32, i32, i32
  }
  func.func @transform_6(%arg0: i32) -> (i32, i32, i32, i32) {
    %c0_i32 = arith.constant 0 : i32
    %c0_i32_0 = arith.constant 0 : i32
    %c0_i32_1 = arith.constant 0 : i32
    %c0_i32_2 = arith.constant 0 : i32
    return %arg0, %c0_i32, %c0_i32_0, %c0_i32_1 : i32, i32, i32, i32
  }
}

</mosaic_0001>

<bundles_post_ra>
// kernel: tpu_custom_call.1
= control target key start
LH: loop header
LB: loop body
LE: loop exit
PB: predicated region body
PF: predicated region fallthrough
CT: control target
= control target key end

     0   :  { %12 = vsyncpa [#allocation3], 0  ;;  %s3297_s0 = inlined_call_operand.hbm [shape: f32[2,8,8,128], index: 0, kind: input, shape index: {}]   ;;  %s3298_s1 = inlined_call_operand.hbm [shape: f32[128,128], index: 1, kind: input, shape index: {}]   ;;  %s3299_s2 = inlined_call_operand.vmem [shape: f32[1,128], index: 2, kind: input, shape index: {}]   ;;  %s3300_s3 = inlined_call_operand.hbm [shape: f32[3,384,128], index: 3, kind: input, shape index: {}]   ;;  %s3301_s4 = inlined_call_operand.vmem [shape: f32[1,128], index: 4, kind: input, shape index: {}]   ;;  %s3302_s5 = inlined_call_operand.hbm [shape: f32[2,8,8,128], index: 5, kind: output, shape index: {0}]   ;;  %s3303_s6 = inlined_call_operand.hbm [shape: f32[2,8,8,128], index: 6, kind: output, shape index: {1}]  }
   0x1   :  { %13 = vsyncpa [#allocation6], 0 }
   0x2   :  { %14 = vsyncpa [#allocation4], 0 }
   0x3   :  { %15 = vsyncpa [#allocation10], 0  ;;  %s2640_s21 = smov [#allocation5]   ;;  %s2641_s23 = smov [#allocation2]  }
   0x4   :  { %s33_s22 = sshll.u32 %s2640_s21, 4  ;;  %s21_s24 = sshll.u32 %s2641_s23, 4  ;;  %s34_s22 = int_to_ptr.vmem [resolvable:$true] %s33_s22  ;;  %s2683_s24 = int_to_ptr.vmem [resolvable:$true] %s21_s24 }
   0x5   :  { %s2522_s27 = scalar_lea.hbm %s3298_s1, 2048 }
   0x6   :  { %p2523_p0 = scmp.ne.s32.totalorder %s3298_s1, %s2522_s27  ;;  %p2526_p1 = scmp.lt.u32.totalorder %s2522_s27, %s3298_s1 }
   0x8   :  { %p2528_p2 = pnand %p2526_p1, %p2523_p0 }
   0xa   :  { %2531 = shalt.err (!%p2528_p2)
}
   0xb   :  { %s2532_s8 = scalar_lea.vmem %s34_s22, 2048  ;;  %p2537_p4 = scmp.lt.s32.totalorder %s34_s22, %s34_s22 }
   0xc   :  { %p2533_p3 = scmp.ne.s32.totalorder %s34_s22, %s2532_s8  ;;  %p2538_p5 = scmp.lt.s32.totalorder %s2532_s8, %s2532_s8 }
   0xe   :  { %p2539_p6 = por %p2538_p5, %p2537_p4 }
  0x10   :  { %p2540_p7 = pnand %p2539_p6, %p2533_p3 }
  0x12   :  { %2543 = shalt.err (!%p2540_p7)
}
  0x13   :  { %s2642_s9 = smov 128   ;;  %s2643_s10 = smov 8  }
  0x14   :  { %39 = dma.hbm_to_vmem [thread:$0]  %s3298_s1, 2048, %s34_s22, [#allocation6], %s2642_s9, %s2642_s9, %s2643_s10  }
  0x15   :  { %s2544_s15 = scalar_lea.hbm %s3297_s0, 2048 }
  0x16   :  { %p2545_p8 = scmp.ne.s32.totalorder %s3297_s0, %s2544_s15  ;;  %p2548_p9 = scmp.lt.u32.totalorder %s2544_s15, %s3297_s0 }
  0x18   :  { %p2550_p10 = pnand %p2548_p9, %p2545_p8 }
  0x1a   :  { %2553 = shalt.err (!%p2550_p10)
}
  0x1b   :  { %s2554_s20 = scalar_lea.vmem %s2683_s24, 2048  ;;  %p2559_p12 = scmp.lt.s32.totalorder %s2683_s24, %s2683_s24 }
  0x1c   :  { %p2555_p11 = scmp.ne.s32.totalorder %s2683_s24, %s2554_s20  ;;  %p2560_p13 = scmp.lt.s32.totalorder %s2554_s20, %s2554_s20 }
  0x1e   :  { %p2561_p0 = por %p2560_p13, %p2559_p12 }
  0x20   :  { %p2562_p1 = pnand %p2561_p0, %p2555_p11 }
  0x22   :  { %2565 = shalt.err (!%p2562_p1)
}
  0x23   :  { %27 = dma.hbm_to_vmem [thread:$0]  %s3297_s0, 2048, %s2683_s24, [#allocation3], %s2642_s9, %s2642_s9, %s2643_s10  }
  0x24   :  { %s2644_s22 = smov [#allocation7]   ;;  %s2566_s27 = scalar_lea.hbm %s3300_s3, 18432 }
  0x25   :  { %s47_s23 = sshll.u32 %s2644_s22, 4  ;;  %p2567_p2 = scmp.ne.s32.totalorder %s3300_s3, %s2566_s27  ;;  %s48_s23 = int_to_ptr.vmem [resolvable:$true] %s47_s23 }
  0x26   :  { %p2570_p3 = scmp.lt.u32.totalorder %s2566_s27, %s3300_s3 }
  0x28   :  { %p2572_p4 = pnand %p2570_p3, %p2567_p2 }
  0x2a   :  { %2575 = shalt.err (!%p2572_p4)
}
  0x2b   :  { %s2576_s8 = scalar_lea.vmem %s48_s23, 18432  ;;  %p2581_p6 = scmp.lt.s32.totalorder %s48_s23, %s48_s23 }
  0x2c   :  { %p2577_p5 = scmp.ne.s32.totalorder %s48_s23, %s2576_s8  ;;  %p2582_p7 = scmp.lt.s32.totalorder %s2576_s8, %s2576_s8 }
  0x2e   :  { %p2583_p8 = por %p2582_p7, %p2581_p6 }
  0x30   :  { %p2584_p9 = pnand %p2583_p8, %p2577_p5 }
  0x32   :  { %2587 = shalt.err (!%p2584_p9)
}
  0x33   :  { %53 = dma.hbm_to_vmem [thread:$0]  %s3300_s3, 18432, %s48_s23, [#allocation6], %s2642_s9, %s2642_s9, %s2643_s10  }
  0x34   :  { %2632 = dma.done.wait [#allocation3], 2048  }
  0x35   :  { %2633 = vsyncadd [#allocation3], 4294965248 }
  0x36   :  { %2634 = dma.done.wait [#allocation6], 20480  }
  0x37   :  { %2635 = vsyncadd [#allocation6], 4294946816  ;;  %v81_v0 = vld [vmem:[#allocation5] sm:$0xff]  ;;  %v82_v1 = vld [vmem:[#allocation5 + $0x8] sm:$0xff]  ;;  %vm313_vm0 = vcmask 1040384   ;;  %vm362_vm2 = vcmask 1046528  }
  0x38   :  { %v83_v2 = vld [vmem:[#allocation5 + $0x10] sm:$0xff]  ;;  %v2210_v3 = vpack.c.bf16 %v82_v1, %v81_v0  ;;  %v84_v4 = vld [vmem:[#allocation5 + $0x18] sm:$0xff]  ;;  %v85_v6 = vld [vmem:[#allocation5 + $0x20] sm:$0xff] }
  0x39   :  { %v2214_v5 = vpack.c.bf16 %v84_v4, %v83_v2  ;;  %v86_v7 = vld [vmem:[#allocation5 + $0x28] sm:$0xff]  ;;  %v65_v9 = vld [vmem:[#allocation2] sm:$0xff]  ;;  %v87_v10 = vld [vmem:[#allocation5 + $0x30] sm:$0xff] }
  0x3a   :  { %2211 = vmatprep.subr.bf16.mxu1 %v2210_v3  ;;  %v2218_v8 = vpack.c.bf16 %v86_v7, %v85_v6  ;;  %v88_v11 = vld [vmem:[#allocation5 + $0x38] sm:$0xff]  ;;  %2018 = vmatprep.mubr.f32.mxu1 %v65_v9  ;;  %v89_v13 = vld [vmem:[#allocation5 + $0x40] sm:$0xff]  ;;  %v90_v14 = vld [vmem:[#allocation5 + $0x48] sm:$0xff] }
  0x3b   :  { %2213 = vmatpush3.bf16.msra.mxu1 %v2210_v3  ;;  %v2222_v12 = vpack.c.bf16 %v88_v11, %v87_v10  ;;  %v460_v15 = vld [vmem:[#allocation7 + $0x280] sm:$0xff]  ;;  %v461_v16 = vld [vmem:[#allocation7 + $0x288] sm:$0xff]  ;;  %v2226_v18 = vpack.c.bf16 %v90_v14, %v89_v13  ;;  %v462_v19 = vld [vmem:[#allocation7 + $0x290] sm:$0xff] }
  0x3c   :  { %2215 = vmatprep.subr.bf16.mxu1 %v2214_v5  ;;  %v2274_v17 = vpack.c.bf16 %v461_v16, %v460_v15  ;;  %v463_v20 = vld [vmem:[#allocation7 + $0x298] sm:$0xff]  ;;  %v91_v21 = vld [vmem:[#allocation5 + $0x50] sm:$0xff]  ;;  %v464_v24 = vld [vmem:[#allocation7 + $0x2a0] sm:$0xff] }
  0x3d   :  { %v92_v22 = vld [vmem:[#allocation5 + $0x58] sm:$0xff]  ;;  %v2278_v23 = vpack.c.bf16 %v463_v20, %v462_v19  ;;  %v465_v25 = vld [vmem:[#allocation7 + $0x2a8] sm:$0xff]  ;;  %v466_v28 = vld [vmem:[#allocation7 + $0x2b0] sm:$0xff] }
  0x3e   :  { %2275 = vmatprep.subr.bf16.mxu0 %v2274_v17  ;;  %v2282_v26 = vpack.c.bf16 %v465_v25, %v464_v24  ;;  %v2230_v27 = vpack.c.bf16 %v92_v22, %v91_v21  ;;  %v467_v29 = vld [vmem:[#allocation7 + $0x2b8] sm:$0xff]  ;;  %v93_v30 = vld [vmem:[#allocation5 + $0x60] sm:$0xff]  ;;  %v94_v31 = vld [vmem:[#allocation5 + $0x68] sm:$0xff] }
  0x3f   :  { %2217 = vmatpush3.bf16.msra.mxu1 %v2214_v5  ;;  %2277 = vmatpush3.bf16.msra.mxu0 %v2274_v17  ;;  %v2286_v32 = vpack.c.bf16 %v467_v29, %v466_v28  ;;  %v2234_v33 = vpack.c.bf16 %v94_v31, %v93_v30  ;;  %v468_v34 = vld [vmem:[#allocation7 + $0x2c0] sm:$0xff]  ;;  %v469_v35 = vld [vmem:[#allocation7 + $0x2c8] sm:$0xff]  ;;  %v95_v36 = vld [vmem:[#allocation5 + $0x70] sm:$0xff] }
  0x40   :  { %2219 = vmatprep.subr.bf16.mxu1 %v2218_v8  ;;  %2279 = vmatprep.subr.bf16.mxu0 %v2278_v23  ;;  %v96_v37 = vld [vmem:[#allocation5 + $0x78] sm:$0xff]  ;;  %v2290_v38 = vpack.c.bf16 %v469_v35, %v468_v34  ;;  %v470_v40 = vld [vmem:[#allocation7 + $0x2d0] sm:$0xff]  ;;  %v444_v42 = vld [vmem:[#allocation7 + $0x200] sm:$0xff] }
  0x41   :  { %v2238_v39 = vpack.c.bf16 %v96_v37, %v95_v36  ;;  %v471_v41 = vld [vmem:[#allocation7 + $0x2d8] sm:$0xff]  ;;  %v445_v43 = vld [vmem:[#allocation7 + $0x208] sm:$0xff]  ;;  %v428_v46 = vld [vmem:[#allocation7 + $0x180] sm:$0xff] }
  0x42   :  { %v2294_v44 = vpack.c.bf16 %v471_v41, %v470_v40  ;;  %v2242_v45 = vpack.c.bf16 %v445_v43, %v444_v42  ;;  %v429_v47 = vld [vmem:[#allocation7 + $0x188] sm:$0xff]  ;;  %v446_v48 = vld [vmem:[#allocation7 + $0x210] sm:$0xff]  ;;  %v447_v49 = vld [vmem:[#allocation7 + $0x218] sm:$0xff] }
  0x43   :  { %2221 = vmatpush3.bf16.msra.mxu1 %v2218_v8  ;;  %2281 = vmatpush3.bf16.msra.mxu0 %v2278_v23  ;;  %v472_v50 = vld [vmem:[#allocation7 + $0x2e0] sm:$0xff]  ;;  %v473_v51 = vld [vmem:[#allocation7 + $0x2e8] sm:$0xff]  ;;  %v2244_v53 = vpack.c.bf16 %v429_v47, %v428_v46  ;;  %v67_v54 = vld [vmem:[#allocation2 + $0x10] sm:$0xff]  ;;  %v2246_v55 = vpack.c.bf16 %v447_v49, %v446_v48 }
  0x44   :  { %2223 = vmatprep.subr.bf16.mxu1 %v2222_v12  ;;  %2283 = vmatprep.subr.bf16.mxu0 %v2282_v26  ;;  %v66_v52 = vld [vmem:[#allocation2 + $0x8] sm:$0xff]  ;;  %v430_v56 = vld [vmem:[#allocation7 + $0x190] sm:$0xff]  ;;  %v431_v57 = vld [vmem:[#allocation7 + $0x198] sm:$0xff]  ;;  %v2298_v58 = vpack.c.bf16 %v473_v51, %v472_v50 }
  0x45   :  { %v448_v59 = vld [vmem:[#allocation7 + $0x220] sm:$0xff]  ;;  %v449_v60 = vld [vmem:[#allocation7 + $0x228] sm:$0xff]  ;;  %v68_v61 = vld [vmem:[#allocation2 + $0x18] sm:$0xff]  ;;  %v2248_v62 = vpack.c.bf16 %v431_v57, %v430_v56 }
  0x46   :  { %v69_v63 = vld [vmem:[#allocation2 + $0x20] sm:$0xff]  ;;  %v2250_v0 = vpack.c.bf16 %v449_v60, %v448_v59  ;;  %v433_v2 = vld [vmem:[#allocation7 + $0x1a8] sm:$0xff]  ;;  %v450_v3 = vld [vmem:[#allocation7 + $0x230] sm:$0xff] }
  0x47   :  { %2225 = vmatpush3.bf16.msra.mxu1 %v2222_v12  ;;  %2285 = vmatpush3.bf16.msra.mxu0 %v2282_v26  ;;  %v432_v1 = vld [vmem:[#allocation7 + $0x1a0] sm:$0xff]  ;;  %v451_v4 = vld [vmem:[#allocation7 + $0x238] sm:$0xff]  ;;  %v70_v5 = vld [vmem:[#allocation2 + $0x28] sm:$0xff] }
  0x48   :  { %2227 = vmatprep.subr.bf16.mxu1 %v2226_v18  ;;  %2287 = vmatprep.subr.bf16.mxu0 %v2286_v32  ;;  %v2252_v6 = vpack.c.bf16 %v433_v2, %v432_v1  ;;  %v71_v7 = vld [vmem:[#allocation2 + $0x30] sm:$0xff]  ;;  %v2254_v8 = vpack.c.bf16 %v451_v4, %v450_v3  ;;  %v435_v10 = vld [vmem:[#allocation7 + $0x1b8] sm:$0xff]  ;;  %v452_v11 = vld [vmem:[#allocation7 + $0x240] sm:$0xff] }
  0x49   :  { %v434_v9 = vld [vmem:[#allocation7 + $0x1b0] sm:$0xff]  ;;  %v453_v12 = vld [vmem:[#allocation7 + $0x248] sm:$0xff]  ;;  %v72_v13 = vld [vmem:[#allocation2 + $0x38] sm:$0xff] }
  0x4a   :  { %v2256_v14 = vpack.c.bf16 %v435_v10, %v434_v9  ;;  %v73_v15 = vld [vmem:[#allocation2 + $0x40] sm:$0xff]  ;;  %v2258_v16 = vpack.c.bf16 %v453_v12, %v452_v11  ;;  %v454_v19 = vld [vmem:[#allocation7 + $0x250] sm:$0xff]  ;;  %v455_v20 = vld [vmem:[#allocation7 + $0x258] sm:$0xff] }
  0x4b   :  { %2229 = vmatpush3.bf16.msra.mxu1 %v2226_v18  ;;  %2289 = vmatpush3.bf16.msra.mxu0 %v2286_v32  ;;  %v436_v17 = vld [vmem:[#allocation7 + $0x1c0] sm:$0xff]  ;;  %v437_v18 = vld [vmem:[#allocation7 + $0x1c8] sm:$0xff]  ;;  %v75_v23 = vld [vmem:[#allocation2 + $0x50] sm:$0xff]  ;;  %v2262_v24 = vpack.c.bf16 %v455_v20, %v454_v19 }
  0x4c   :  { %2231 = vmatprep.subr.bf16.mxu1 %v2230_v27  ;;  %2291 = vmatprep.subr.bf16.mxu0 %v2290_v38  ;;  %v74_v21 = vld [vmem:[#allocation2 + $0x48] sm:$0xff]  ;;  %v2260_v22 = vpack.c.bf16 %v437_v18, %v436_v17  ;;  %v438_v25 = vld [vmem:[#allocation7 + $0x1d0] sm:$0xff]  ;;  %v439_v26 = vld [vmem:[#allocation7 + $0x1d8] sm:$0xff] }
  0x4d   :  { %v457_v28 = vld [vmem:[#allocation7 + $0x268] sm:$0xff]  ;;  %v76_v29 = vld [vmem:[#allocation2 + $0x58] sm:$0xff]  ;;  %v2264_v30 = vpack.c.bf16 %v439_v26, %v438_v25  ;;  %v77_v31 = vld [vmem:[#allocation2 + $0x60] sm:$0xff] }
  0x4e   :  { %v441_v34 = vld [vmem:[#allocation7 + $0x1e8] sm:$0xff]  ;;  %v79_v37 = vld [vmem:[#allocation2 + $0x70] sm:$0xff]  ;;  %v459_v40 = vld [vmem:[#allocation7 + $0x278] sm:$0xff] }
  0x4f   :  { %2233 = vmatpush3.bf16.msra.mxu1 %v2230_v27  ;;  %2293 = vmatpush3.bf16.msra.mxu0 %v2290_v38  ;;  %v456_v27 = vld [vmem:[#allocation7 + $0x260] sm:$0xff]  ;;  %v78_v35 = vld [vmem:[#allocation2 + $0x68] sm:$0xff]  ;;  %v80_v38 = vld [vmem:[#allocation2 + $0x78] sm:$0xff] }
  0x50   :  { %2235 = vmatprep.subr.bf16.mxu1 %v2234_v33  ;;  %2295 = vmatprep.subr.bf16.mxu0 %v2294_v44  ;;  %v2266_v32 = vpack.c.bf16 %v457_v28, %v456_v27  ;;  %v474_v42 = vld [vmem:[#allocation7 + $0x2f0] sm:$0xff]  ;;  %v475_v43 = vld [vmem:[#allocation7 + $0x2f8] sm:$0xff]  ;;  %v395_v48 = vld [vmem:[#allocation7 + $0x80] sm:$0xff] }
  0x51   :  { %v443_v46 = vld [vmem:[#allocation7 + $0x1f8] sm:$0xff]  ;;  %v396_v49 = vld [vmem:[#allocation7 + $0x88] sm:$0xff]  ;;  %v1073_v51 = vld [vmem:[#allocation7 + $0x380] sm:$0xff] }
  0x52   :  { %v2306_v50 = vpack.c.bf16 %v396_v49, %v395_v48  ;;  %v379_v56 = vld [vmem:[#allocation7] sm:$0xff]  ;;  %v380_v57 = vld [vmem:[#allocation7 + $0x8] sm:$0xff]  ;;  %v397_v60 = vld [vmem:[#allocation7 + $0x90] sm:$0xff] }
  0x53   :  { %2237 = vmatpush3.bf16.msra.mxu1 %v2234_v33  ;;  %2297 = vmatpush3.bf16.msra.mxu0 %v2294_v44  ;;  %v440_v33 = vld [vmem:[#allocation7 + $0x1e0] sm:$0xff]  ;;  %v2302_v44 = vpack.c.bf16 %v475_v43, %v474_v42  ;;  %v1075_v1 = vld [vmem:[#allocation7 + $0x390] sm:$0xff]  ;;  %v1076_v2 = vld [vmem:[#allocation7 + $0x398] sm:$0xff] }
  0x54   :  { %2239 = vmatprep.subr.bf16.mxu1 %v2238_v39  ;;  %2299 = vmatprep.subr.bf16.mxu0 %v2298_v58  ;;  %v2268_v36 = vpack.c.bf16 %v441_v34, %v440_v33  ;;  %vm2747_vm1 = vmneg %vm313_vm0  ;;  %v382_v9 = vld [vmem:[#allocation7 + $0x18] sm:$0xff]  ;;  %v1059_v17 = vld [vmem:[#allocation7 + $0x310] sm:$0xff] }
  0x55   :  { %v1060_v18 = vld [vmem:[#allocation7 + $0x318] sm:$0xff]  ;;  %v400_v20 = vld [vmem:[#allocation7 + $0xa8] sm:$0xff]  ;;  %v383_v27 = vld [vmem:[#allocation7 + $0x20] sm:$0xff] }
  0x56   :  { %v384_v28 = vld [vmem:[#allocation7 + $0x28] sm:$0xff]  ;;  %v401_v34 = vld [vmem:[#allocation7 + $0xb0] sm:$0xff] }
  0x57   :  { %2241 = vmatpush3.bf16.msra.mxu1 %v2238_v39  ;;  %2301 = vmatpush3.bf16.msra.mxu0 %v2298_v58  ;;  %v458_v39 = vld [vmem:[#allocation7 + $0x270] sm:$0xff] }
  0x58   :  { %2243 = vmatprep.subr.bf16.mxu1 %v2242_v45  ;;  %v2270_v41 = vpack.c.bf16 %v459_v40, %v458_v39  ;;  %v442_v45 = vld [vmem:[#allocation7 + $0x1f0] sm:$0xff]  ;;  %2303 = vmatprep.subr.bf16.mxu0 %v2302_v44  ;;  %v402_v39 = vld [vmem:[#allocation7 + $0xb8] sm:$0xff] }
  0x59   :  { %v2272_v47 = vpack.c.bf16 %v443_v46, %v442_v45  ;;  %v1079_v40 = vld [vmem:[#allocation7 + $0x3b0] sm:$0xff]  ;;  %v2316_v45 = vpack.c.bf16 %v384_v28, %v383_v27 }
  0x5a   :  { %2019 = vmatmul.mubr.f32.vlgmr.msra.gmra.mrb[0].mxu1 %v66_v52  ;;  %v1074_v52 = vld [vmem:[#allocation7 + $0x388] sm:$0xff]  ;;  %v385_v46 = vld [vmem:[#allocation7 + $0x30] sm:$0xff] }
  0x5b   :  { %2021 = vmatprep.mubr.f32.mxu1 %v67_v54  ;;  %2245 = vmatpush3.bf16.msra.mxu1 %v2244_v53  ;;  %v2370_v53 = vpack.c.bf16 %v1074_v52, %v1073_v51  ;;  %v2738_v54 = vld [vmem:[%s3299_s2] ss:$0 sm:$0xff]  ;;  %v2318_v52 = vpack.c.bf16 %v402_v39, %v401_v34  ;;  %v390_v34 = vld [vmem:[#allocation7 + $0x58] sm:$0xff]  ;;  %s2646_s2 = smov [#allocation8]  }
  0x5c   :  { %2247 = vmatprep.subr.bf16.mxu1 %v2246_v55  ;;  %2305 = vmatpush3.bf16.msra.mxu0 %v2302_v44  ;;  %s1455_s12 = sshll.u32 %s2646_s2, 4  ;;  %s1456_s12 = int_to_ptr.vmem [resolvable:$true] %s1455_s12 }
  0x5d   :  { %2307 = vmatprep.subr.bf16.mxu0 %v2306_v50  ;;  %s2588_s13 = scalar_lea.vmem %s1456_s12, 2048  ;;  %p2593_p11 = scmp.lt.s32.totalorder %s1456_s12, %s1456_s12 }
  0x5e   :  { %2022 = vmatmul.mubr.f32.gmra.mrb[2].mxu1 %v68_v61  ;;  %v1057_v61 = vld [vmem:[#allocation7 + $0x300] sm:$0xff]  ;;  %p2589_p10 = scmp.ne.s32.totalorder %s1456_s12, %s2588_s13  ;;  %p2594_p12 = scmp.lt.s32.totalorder %s2588_s13, %s2588_s13 }
  0x5f   :  { %2024 = vmatprep.mubr.f32.mxu1 %v69_v63  ;;  %2249 = vmatpush3.bf16.msra.mxu1 %v2248_v62  ;;  %v1058_v62 = vld [vmem:[#allocation7 + $0x308] sm:$0xff] }
  0x60   :  { %2251 = vmatprep.subr.bf16.mxu1 %v2250_v0  ;;  %v398_v0 = vld [vmem:[#allocation7 + $0x98] sm:$0xff]  ;;  %v2372_v10 = vpack.c.bf16 %v1058_v62, %v1057_v61  ;;  %v1081_v61 = vld [vmem:[#allocation7 + $0x3c0] sm:$0xff]  ;;  %v1082_v62 = vld [vmem:[#allocation7 + $0x3c8] sm:$0xff]  ;;  %p2595_p13 = por %p2594_p12, %p2593_p11 }
  0x62   :  { %2025 = vmatmul.mubr.f32.gmra.mrb[4].mxu1 %v70_v5  ;;  %p2596_p0 = pnand %p2595_p13, %p2589_p10 }
  0x63   :  { %2027 = vmatprep.mubr.f32.mxu1 %v71_v7  ;;  %2253 = vmatpush3.bf16.msra.mxu1 %v2252_v6  ;;  %v2308_v7 = vpack.c.bf16 %v380_v57, %v379_v56  ;;  %v1063_v56 = vld [vmem:[#allocation7 + $0x330] sm:$0xff]  ;;  %v1064_v57 = vld [vmem:[#allocation7 + $0x338] sm:$0xff] }
  0x64   :  { %2255 = vmatprep.subr.bf16.mxu1 %v2254_v8  ;;  %v381_v8 = vld [vmem:[#allocation7 + $0x10] sm:$0xff] }
  0x65   :  { %v2312_v26 = vpack.c.bf16 %v382_v9, %v381_v8  ;;  %v388_v8 = vld [vmem:[#allocation7 + $0x48] sm:$0xff]  ;;  %v2384_v9 = vpack.c.bf16 %v1064_v57, %v1063_v56 }
  0x66   :  { %2028 = vmatmul.mubr.f32.gmra.mrb[6].mxu1 %v72_v13 }
  0x67   :  { %2030 = vmatprep.mubr.f32.mxu1 %v73_v15  ;;  %2257 = vmatpush3.bf16.msra.mxu1 %v2256_v14  ;;  %v2310_v14 = vpack.c.bf16 %v398_v0, %v397_v60  ;;  %v399_v15 = vld [vmem:[#allocation7 + $0xa0] sm:$0xff]  ;;  %v404_v60 = vld [vmem:[#allocation7 + $0xc8] sm:$0xff] }
  0x68   :  { %2259 = vmatprep.subr.bf16.mxu1 %v2258_v16  ;;  %v2374_v16 = vpack.c.bf16 %v1076_v2, %v1075_v1  ;;  %v2314_v33 = vpack.c.bf16 %v400_v20, %v399_v15  ;;  %v1066_v20 = vld [vmem:[#allocation7 + $0x348] sm:$0xff] }
  0x6a   :  { %2031 = vmatmul.mubr.f32.gmra.mrb[8].mxu1 %v74_v21  ;;  %v1077_v21 = vld [vmem:[#allocation7 + $0x3a0] sm:$0xff] }
  0x6b   :  { %2033 = vmatprep.mubr.f32.mxu1 %v75_v23  ;;  %2261 = vmatpush3.bf16.msra.mxu1 %v2260_v22  ;;  %v1078_v22 = vld [vmem:[#allocation7 + $0x3a8] sm:$0xff] }
  0x6c   :  { %2263 = vmatprep.subr.bf16.mxu1 %v2262_v24 }
  0x6e   :  { %2034 = vmatmul.mubr.f32.gmra.mrb[10].mxu1 %v76_v29  ;;  %v2376_v29 = vpack.c.bf16 %v1060_v18, %v1059_v17  ;;  %v2386_v17 = vpack.c.bf16 %v1082_v62, %v1081_v61  ;;  %v1065_v18 = vld [vmem:[#allocation7 + $0x340] sm:$0xff]  ;;  %v392_v61 = vld [vmem:[#allocation7 + $0x68] sm:$0xff] }
  0x6f   :  { %2036 = vmatprep.mubr.f32.mxu1 %v77_v31  ;;  %2265 = vmatpush3.bf16.msra.mxu1 %v2264_v30 }
  0x70   :  { %2267 = vmatprep.subr.bf16.mxu1 %v2266_v32 }
  0x72   :  { %2037 = vmatmul.mubr.f32.gmra.mrb[12].mxu1 %v78_v35  ;;  %v2378_v35 = vpack.c.bf16 %v1078_v22, %v1077_v21  ;;  %v406_v22 = vld [vmem:[#allocation7 + $0xd8] sm:$0xff] }
  0x73   :  { %2039 = vmatprep.mubr.f32.mxu1 %v79_v37  ;;  %2269 = vmatpush3.bf16.msra.mxu1 %v2268_v36  ;;  %v1061_v36 = vld [vmem:[#allocation7 + $0x320] sm:$0xff]  ;;  %v1062_v37 = vld [vmem:[#allocation7 + $0x328] sm:$0xff] }
  0x74   :  { %2271 = vmatprep.subr.bf16.mxu1 %v2270_v41  ;;  %v1080_v41 = vld [vmem:[#allocation7 + $0x3b8] sm:$0xff]  ;;  %v2380_v48 = vpack.c.bf16 %v1062_v37, %v1061_v36 }
  0x76   :  { %2040 = vmatmul.mubr.f32.gmra.mrb[14].mxu1 %v80_v38 }
  0x77   :  { %2273 = vmatpush3.bf16.msra.mxu1 %v2272_v47  ;;  %v386_v47 = vld [vmem:[#allocation7 + $0x38] sm:$0xff] }
  0x78   :  { %2371 = vmatprep.subr.bf16.mxu1 %v2370_v53  ;;  %v403_v53 = vld [vmem:[#allocation7 + $0xc0] sm:$0xff] }
  0x79   :  { %v2322_v15 = vpack.c.bf16 %v404_v60, %v403_v53  ;;  %v391_v60 = vld [vmem:[#allocation7 + $0x60] sm:$0xff] }
 0x12d   :  { %v2020_v55 = vpop.f32.mrb[0].mxu1 }
 0x12e   :  { %v2741_v58 = vadd.f32 %v2020_v55, %v2738_v54  ;;  %v170_v59 = vpop.f32.mrb[1].mxu1  ;;  %v2382_v55 = vpack.c.bf16 %v1080_v41, %v1079_v40  ;;  %v407_v41 = vld [vmem:[#allocation7 + $0xe0] sm:$0xff] }
 0x12f   :  { %v2744_v63 = vadd.f32 %v2738_v54, %v170_v59 }
 0x130   :  { %250 = vst [vmem:[#allocation8 + $0x8] sm:$0xff] %v2741_v58  ;;  %v2759_v13 = vrot.slane %v2741_v58, 1  ;;  %v2777_v24 = vrot.slane %v2741_v58, 7 }
 0x131   :  { %249 = vst [vmem:[#allocation8] sm:$0xff] %v2744_v63  ;;  %v281_v4 = vrot.slane %v2744_v63, 7  ;;  %v2023_v5 = vpop.f32.mrb[2].mxu1  ;;  %540 = vmatprep.mubr.f32.mxu1 %v2744_v63  ;;  %v330_v6 = vrot.slane %v2744_v63, 1 }
 0x132   :  { %v2756_v11 = vadd.f32 %v2023_v5, %v2738_v54  ;;  %v180_v12 = vpop.f32.mrb[3].mxu1  ;;  %v2320_v5 = vpack.c.bf16 %v386_v47, %v385_v46  ;;  %v1068_v46 = vld [vmem:[#allocation7 + $0x358] sm:$0xff] }
 0x133   :  { %v2762_v19 = vadd.f32 %v2738_v54, %v180_v12  ;;  %1486 = vmatmul.mubr.msk.f32.vlgmr.msra.gmra.mrb[16].mxu1 %vm2747_vm1, %v281_v4  ;;  %2074 = vmatprep.mubr.msk.f32.mxu0 %vm362_vm2, %v330_v6 }
 0x134   :  { %252 = vst [vmem:[#allocation8 + $0x18] sm:$0xff] %v2756_v11  ;;  %545 = vmatprep.mubr.f32.mxu1 %v2741_v58  ;;  %2075 = vmatmul.mubr.msk.f32.vlgmr.msra.gmra.mrb[0].mxu0 %vm362_vm2, %v2759_v13  ;;  %v2786_v32 = vrot.slane %v2756_v11, 1  ;;  %v2827_v1 = vrot.slane %v2756_v11, 7 }
 0x135   :  { %251 = vst [vmem:[#allocation8 + $0x10] sm:$0xff] %v2762_v19  ;;  %2309 = vmatpush3.bf16.msra.mxu0 %v2308_v7  ;;  %v2026_v23 = vpop.f32.mrb[4].mxu1  ;;  %v2780_v25 = vrot.slane %v2762_v19, 1  ;;  %2373 = vmatpush3.bf16.msra.mxu1 %v2372_v10  ;;  %v2802_v43 = vrot.slane %v2762_v19, 7  ;;  %v387_v7 = vld [vmem:[#allocation7 + $0x40] sm:$0xff] }
 0x136   :  { %v2783_v30 = vadd.f32 %v2026_v23, %v2738_v54  ;;  %v190_v31 = vpop.f32.mrb[5].mxu1  ;;  %2311 = vmatprep.subr.bf16.mxu0 %v2310_v14  ;;  %2375 = vmatprep.subr.bf16.mxu1 %v2374_v16  ;;  %v405_v16 = vld [vmem:[#allocation7 + $0xd0] sm:$0xff] }
 0x137   :  { %v2789_v38 = vadd.f32 %v2738_v54, %v190_v31  ;;  %1488 = vmatmul.mubr.msk.f32.gmra.mrb[18].mxu1 %vm2747_vm1, %v2777_v24  ;;  %2077 = vmatprep.mubr.msk.f32.mxu0 %vm362_vm2, %v2780_v25  ;;  %v1083_v23 = vld [vmem:[#allocation7 + $0x3d0] sm:$0xff]  ;;  %v2324_v31 = vpack.c.bf16 %v388_v8, %v387_v7  ;;  %v2326_v40 = vpack.c.bf16 %v406_v22, %v405_v16  ;;  %v1070_v16 = vld [vmem:[#allocation7 + $0x368] sm:$0xff]  ;;  %v1088_v22 = vld [vmem:[#allocation7 + $0x3f8] sm:$0xff] }
 0x138   :  { %254 = vst [vmem:[#allocation8 + $0x28] sm:$0xff] %v2783_v30  ;;  %550 = vmatprep.mubr.f32.mxu1 %v2762_v19  ;;  %2078 = vmatmul.mubr.msk.f32.gmra.mrb[2].mxu0 %vm362_vm2, %v2786_v32  ;;  %v2811_v51 = vrot.slane %v2783_v30, 1 }
 0x139   :  { %253 = vst [vmem:[#allocation8 + $0x20] sm:$0xff] %v2789_v38  ;;  %2313 = vmatpush3.bf16.msra.mxu0 %v2312_v26  ;;  %v2029_v42 = vpop.f32.mrb[6].mxu1  ;;  %v2805_v44 = vrot.slane %v2789_v38, 1  ;;  %2377 = vmatpush3.bf16.msra.mxu1 %v2376_v29  ;;  %v1084_v26 = vld [vmem:[#allocation7 + $0x3d8] sm:$0xff]  ;;  %v2851_v28 = vrot.slane %v2789_v38, 7 }
 0x13a   :  { %v2808_v49 = vadd.f32 %v2029_v42, %v2738_v54  ;;  %v200_v50 = vpop.f32.mrb[7].mxu1  ;;  %2315 = vmatprep.subr.bf16.mxu0 %v2314_v33  ;;  %2379 = vmatprep.subr.bf16.mxu1 %v2378_v35  ;;  %v389_v33 = vld [vmem:[#allocation7 + $0x50] sm:$0xff]  ;;  %v2388_v35 = vpack.c.bf16 %v1066_v20, %v1065_v18  ;;  %v2390_v42 = vpack.c.bf16 %v1084_v26, %v1083_v23  ;;  %v410_v18 = vld [vmem:[#allocation7 + $0xf8] sm:$0xff] }
 0x13b   :  { %v2814_v59 = vadd.f32 %v2738_v54, %v200_v50  ;;  %1490 = vmatmul.mubr.msk.f32.gmra.mrb[20].mxu1 %vm2747_vm1, %v2802_v43  ;;  %2080 = vmatprep.mubr.msk.f32.mxu0 %vm362_vm2, %v2805_v44  ;;  %v1085_v50 = vld [vmem:[#allocation7 + $0x3e0] sm:$0xff]  ;;  %v2328_v57 = vpack.c.bf16 %v390_v34, %v389_v33  ;;  %v1087_v20 = vld [vmem:[#allocation7 + $0x3f0] sm:$0xff] }
 0x13c   :  { %256 = vst [vmem:[#allocation8 + $0x38] sm:$0xff] %v2808_v49  ;;  %555 = vmatprep.mubr.f32.mxu1 %v2756_v11  ;;  %2081 = vmatmul.mubr.msk.f32.gmra.mrb[4].mxu0 %vm362_vm2, %v2811_v51  ;;  %v337_v14 = vrot.slane %v2808_v49, 1 }
 0x13d   :  { %255 = vst [vmem:[#allocation8 + $0x30] sm:$0xff] %v2814_v59  ;;  %2317 = vmatpush3.bf16.msra.mxu0 %v2316_v45  ;;  %v2032_v0 = vpop.f32.mrb[8].mxu1  ;;  %v2830_v2 = vrot.slane %v2814_v59, 1  ;;  %2381 = vmatpush3.bf16.msra.mxu1 %v2380_v48  ;;  %v1067_v45 = vld [vmem:[#allocation7 + $0x350] sm:$0xff]  ;;  %v408_v48 = vld [vmem:[#allocation7 + $0xe8] sm:$0xff]  ;;  %v2900_v26 = vrot.slane %v2814_v59, 7 }
 0x13e   :  { %v2833_v10 = vadd.f32 %v2032_v0, %v2738_v54  ;;  %v210_v12 = vpop.f32.mrb[9].mxu1  ;;  %2319 = vmatprep.subr.bf16.mxu0 %v2318_v52  ;;  %2383 = vmatprep.subr.bf16.mxu1 %v2382_v55  ;;  %v1086_v52 = vld [vmem:[#allocation7 + $0x3e8] sm:$0xff]  ;;  %v2875_v55 = vrot.slane %v2783_v30, 7  ;;  %v2392_v62 = vpack.c.bf16 %v1068_v46, %v1067_v45  ;;  %v2330_v8 = vpack.c.bf16 %v408_v48, %v407_v41  ;;  %v393_v41 = vld [vmem:[#allocation7 + $0x70] sm:$0xff]  ;;  %v411_v45 = vld [vmem:[#allocation7 + $0x100] sm:$0xff] }
 0x13f   :  { %v2837_v21 = vadd.f32 %v2738_v54, %v210_v12  ;;  %1492 = vmatmul.mubr.msk.f32.gmra.mrb[22].mxu1 %vm2747_vm1, %v2827_v1  ;;  %2083 = vmatprep.mubr.msk.f32.mxu0 %vm362_vm2, %v2830_v2  ;;  %v2394_v12 = vpack.c.bf16 %v1086_v52, %v1085_v50  ;;  %v2398_v46 = vpack.c.bf16 %v1088_v22, %v1087_v20  ;;  %v412_v50 = vld [vmem:[#allocation7 + $0x108] sm:$0xff]  ;;  %v1071_v52 = vld [vmem:[#allocation7 + $0x370] sm:$0xff] }
 0x140   :  { %258 = vst [vmem:[#allocation8 + $0x48] sm:$0xff] %v2833_v10  ;;  %560 = vmatprep.mubr.f32.mxu1 %v2789_v38  ;;  %2084 = vmatmul.mubr.msk.f32.gmra.mrb[6].mxu0 %vm362_vm2, %v337_v14  ;;  %v2858_v39 = vrot.slane %v2833_v10, 1  ;;  %v416_v20 = vld [vmem:[#allocation7 + $0x128] sm:$0xff]  ;;  %v2949_v22 = vrot.slane %v2833_v10, 7 }
 0x141   :  { %257 = vst [vmem:[#allocation8 + $0x40] sm:$0xff] %v2837_v21  ;;  %2321 = vmatpush3.bf16.msra.mxu0 %v2320_v5  ;;  %v2035_v27 = vpop.f32.mrb[10].mxu1  ;;  %v338_v29 = vrot.slane %v2837_v21, 1  ;;  %2385 = vmatpush3.bf16.msra.mxu1 %v2384_v9  ;;  %v409_v9 = vld [vmem:[#allocation7 + $0xf0] sm:$0xff] }
 0x142   :  { %v2855_v36 = vadd.f32 %v2035_v27, %v2738_v54  ;;  %v220_v37 = vpop.f32.mrb[11].mxu1  ;;  %2323 = vmatprep.subr.bf16.mxu0 %v2322_v15  ;;  %2387 = vmatprep.subr.bf16.mxu1 %v2386_v17  ;;  %v1069_v15 = vld [vmem:[#allocation7 + $0x360] sm:$0xff] }
 0x143   :  { %v2861_v47 = vadd.f32 %v2738_v54, %v220_v37  ;;  %1494 = vmatmul.mubr.msk.f32.gmra.mrb[24].mxu1 %vm2747_vm1, %v2851_v28  ;;  %2086 = vmatprep.mubr.msk.f32.mxu0 %vm362_vm2, %v338_v29  ;;  %v2396_v33 = vpack.c.bf16 %v1070_v16, %v1069_v15  ;;  %v2645_v15 = vmov 0.0  }
 0x144   :  { %260 = vst [vmem:[#allocation8 + $0x58] sm:$0xff] %v2855_v36  ;;  %565 = vmatprep.mubr.f32.mxu1 %v2783_v30  ;;  %2087 = vmatmul.mubr.msk.f32.gmra.mrb[8].mxu0 %vm362_vm2, %v2858_v39  ;;  %v2884_v7 = vrot.slane %v2855_v36, 1 }
 0x145   :  { %259 = vst [vmem:[#allocation8 + $0x50] sm:$0xff] %v2861_v47  ;;  %2325 = vmatpush3.bf16.msra.mxu0 %v2324_v31  ;;  %v2038_v53 = vpop.f32.mrb[12].mxu1  ;;  %v2878_v56 = vrot.slane %v2861_v47, 1  ;;  %2389 = vmatpush3.bf16.msra.mxu1 %v2388_v35  ;;  %v2332_v31 = vpack.c.bf16 %v392_v61, %v391_v60 }
 0x146   :  { %v2881_v0 = vadd.f32 %v2038_v53, %v2738_v54  ;;  %v230_v5 = vpop.f32.mrb[13].mxu1  ;;  %2327 = vmatprep.subr.bf16.mxu0 %v2326_v40  ;;  %2391 = vmatprep.subr.bf16.mxu1 %v2390_v42  ;;  %v2334_v40 = vpack.c.bf16 %v410_v18, %v409_v9  ;;  %v394_v42 = vld [vmem:[#allocation7 + $0x78] sm:$0xff]  ;;  %v415_v18 = vld [vmem:[#allocation7 + $0x120] sm:$0xff] }
 0x147   :  { %v2887_v17 = vadd.f32 %v2738_v54, %v230_v5  ;;  %1496 = vmatmul.mubr.msk.f32.gmra.mrb[26].mxu1 %vm2747_vm1, %v2875_v55  ;;  %2089 = vmatprep.mubr.msk.f32.mxu0 %vm362_vm2, %v2878_v56  ;;  %v1072_v53 = vld [vmem:[#allocation7 + $0x378] sm:$0xff]  ;;  %v2336_v60 = vpack.c.bf16 %v394_v42, %v393_v41  ;;  %v419_v41 = vld [vmem:[#allocation7 + $0x140] sm:$0xff]  ;;  %v420_v42 = vld [vmem:[#allocation7 + $0x148] sm:$0xff] }
 0x148   :  { %262 = vst [vmem:[#allocation8 + $0x68] sm:$0xff] %v2881_v0  ;;  %570 = vmatprep.mubr.f32.mxu1 %v2814_v59  ;;  %2090 = vmatmul.mubr.msk.f32.gmra.mrb[10].mxu0 %vm362_vm2, %v2884_v7  ;;  %v2909_v37 = vrot.slane %v2881_v0, 1  ;;  %v2400_v5 = vpack.c.bf16 %v1072_v53, %v1071_v52  ;;  %v414_v9 = vld [vmem:[#allocation7 + $0x118] sm:$0xff] }
 0x149   :  { %261 = vst [vmem:[#allocation8 + $0x60] sm:$0xff] %v2887_v17  ;;  %2329 = vmatpush3.bf16.msra.mxu0 %v2328_v57  ;;  %v2041_v23 = vpop.f32.mrb[14].mxu1  ;;  %v2903_v27 = vrot.slane %v2887_v17, 1  ;;  %2393 = vmatpush3.bf16.msra.mxu1 %v2392_v62  ;;  %v2338_v62 = vpack.c.bf16 %v412_v50, %v411_v45  ;;  %v2354_v45 = vpack.c.bf16 %v420_v42, %v419_v41  ;;  %v422_v50 = vld [vmem:[#allocation7 + $0x158] sm:$0xff]  ;;  %v2983_v52 = vrot.slane %v2887_v17, 7 }
 0x14a   :  { %v2906_v34 = vadd.f32 %v2041_v23, %v2738_v54  ;;  %v240_v35 = vpop.f32.mrb[15].mxu1  ;;  %2331 = vmatprep.subr.bf16.mxu0 %v2330_v8  ;;  %2395 = vmatprep.subr.bf16.mxu1 %v2394_v12  ;;  %v413_v8 = vld [vmem:[#allocation7 + $0x110] sm:$0xff]  ;;  %v289_v12 = vrot.slane %v2837_v21, 7  ;;  %v2346_v23 = vpack.c.bf16 %v416_v20, %v415_v18 }
 0x14b   :  { %v2912_v48 = vadd.f32 %v2738_v54, %v240_v35  ;;  %1498 = vmatmul.mubr.msk.f32.gmra.mrb[28].mxu1 %vm2747_vm1, %v2900_v26  ;;  %2092 = vmatprep.mubr.msk.f32.mxu0 %vm362_vm2, %v2903_v27  ;;  %v288_v54 = vrot.slane %v2808_v49, 7  ;;  %v2342_v16 = vpack.c.bf16 %v414_v9, %v413_v8  ;;  %v2961_v35 = vrot.slane %v2861_v47, 7  ;;  %v425_v9 = vld [vmem:[#allocation7 + $0x170] sm:$0xff] }
 0x14c   :  { %264 = vst [vmem:[#allocation8 + $0x78] sm:$0xff] %v2906_v34  ;;  %575 = vmatprep.mubr.f32.mxu1 %v2808_v49  ;;  %2093 = vmatmul.mubr.msk.f32.gmra.mrb[12].mxu0 %vm362_vm2, %v2909_v37  ;;  %v345_v61 = vrot.slane %v2906_v34, 1 }
 0x14d   :  { %263 = vst [vmem:[#allocation8 + $0x70] sm:$0xff] %v2912_v48  ;;  %2333 = vmatpush3.bf16.msra.mxu0 %v2332_v31  ;;  %v2926_v57 = vrot.slane %v2912_v48, 1  ;;  %2397 = vmatpush3.bf16.msra.mxu1 %v2396_v33  ;;  %v417_v31 = vld [vmem:[#allocation7 + $0x130] sm:$0xff]  ;;  %v418_v33 = vld [vmem:[#allocation7 + $0x138] sm:$0xff]  ;;  %v3005_v18 = vrot.slane %v2912_v48, 7 }
 0x14e   :  { %2335 = vmatprep.subr.bf16.mxu0 %v2334_v40  ;;  %2399 = vmatprep.subr.bf16.mxu1 %v2398_v46  ;;  %v2350_v40 = vpack.c.bf16 %v418_v33, %v417_v31  ;;  %v421_v46 = vld [vmem:[#allocation7 + $0x150] sm:$0xff]  ;;  %v1090_v31 = vld [vmem:[#allocation7 + $0x408] sm:$0xff]  ;;  %v296_v33 = vrot.slane %v2906_v34, 7 }
 0x14f   :  { %1500 = vmatmul.mubr.msk.f32.gmra.mrb[30].mxu1 %vm2747_vm1, %v288_v54  ;;  %2095 = vmatprep.mubr.msk.f32.mxu0 %vm362_vm2, %v2926_v57  ;;  %v2358_v53 = vpack.c.bf16 %v422_v50, %v421_v46 }
 0x150   :  { %580 = vmatprep.mubr.f32.mxu1 %v2837_v21  ;;  %2096 = vmatmul.mubr.msk.f32.gmra.mrb[14].mxu0 %vm362_vm2, %v345_v61 }
 0x151   :  { %2337 = vmatpush3.bf16.msra.mxu0 %v2336_v60  ;;  %830 = vmatprep.mubr.f32.mxu0 %v2645_v15  ;;  %v423_v60 = vld [vmem:[#allocation7 + $0x160] sm:$0xff] }
 0x152   :  { %2339 = vmatprep.subr.bf16.mxu0 %v2338_v62  ;;  %2401 = vmatpush3.bf16.msra.mxu1 %v2400_v5  ;;  %v2994_v5 = vrot.slane %v2881_v0, 7 }
 0x153   :  { %1502 = vmatmul.mubr.msk.f32.gmra.mrb[32].mxu1 %vm2747_vm1, %v289_v12 }
 0x154   :  { %585 = vmatprep.mubr.f32.mxu1 %v2833_v10  ;;  %831 = vmatmul.mubr.f32.vlgmr.msra.gmra.mrb[16].mxu0 %v2645_v15 }
 0x155   :  { %2341 = vmatpush3.bf16.msra.mxu0 %v2338_v62  ;;  %835 = vmatprep.mubr.f32.mxu0 %v2744_v63  ;;  %v424_v62 = vld [vmem:[#allocation7 + $0x168] sm:$0xff] }
 0x156   :  { %2343 = vmatprep.subr.bf16.mxu0 %v2342_v16  ;;  %v2362_v8 = vpack.c.bf16 %v424_v62, %v423_v60 }
 0x157   :  { %1504 = vmatmul.mubr.msk.f32.gmra.mrb[34].mxu1 %vm2747_vm1, %v2949_v22 }
 0x158   :  { %590 = vmatprep.mubr.f32.mxu1 %v2861_v47  ;;  %1534 = vmatmul.mubr.msk.f32.gmra.mrb[18].mxu0 %vm2747_vm1, %v281_v4  ;;  %v2972_v4 = vrot.slane %v2855_v36, 7 }
 0x159   :  { %840 = vmatprep.mubr.f32.mxu0 %v2741_v58  ;;  %2345 = vmatpush3.bf16.msra.mxu0 %v2342_v16  ;;  %v426_v16 = vld [vmem:[#allocation7 + $0x178] sm:$0xff] }
 0x15a   :  { %2347 = vmatprep.subr.bf16.mxu0 %v2346_v23  ;;  %v2366_v20 = vpack.c.bf16 %v426_v16, %v425_v9 }
 0x15b   :  { %1506 = vmatmul.mubr.msk.f32.gmra.mrb[36].mxu1 %vm2747_vm1, %v2961_v35 }
 0x15c   :  { %595 = vmatprep.mubr.f32.mxu1 %v2855_v36  ;;  %1536 = vmatmul.mubr.msk.f32.gmra.mrb[20].mxu0 %vm2747_vm1, %v2777_v24 }
 0x15d   :  { %845 = vmatprep.mubr.f32.mxu0 %v2762_v19  ;;  %2349 = vmatpush3.bf16.msra.mxu0 %v2346_v23  ;;  %v1089_v23 = vld [vmem:[#allocation7 + $0x400] sm:$0xff] }
 0x15e   :  { %2351 = vmatprep.subr.bf16.mxu0 %v2350_v40 }
 0x15f   :  { %1508 = vmatmul.mubr.msk.f32.gmra.mrb[38].mxu1 %vm2747_vm1, %v2972_v4 }
 0x160   :  { %600 = vmatprep.mubr.f32.mxu1 %v2887_v17  ;;  %1538 = vmatmul.mubr.msk.f32.gmra.mrb[22].mxu0 %vm2747_vm1, %v2802_v43 }
 0x161   :  { %850 = vmatprep.mubr.f32.mxu0 %v2756_v11  ;;  %2353 = vmatpush3.bf16.msra.mxu0 %v2350_v40  ;;  %v2402_v40 = vpack.c.bf16 %v1090_v31, %v1089_v23 }
 0x162   :  { %2355 = vmatprep.subr.bf16.mxu0 %v2354_v45 }
 0x163   :  { %1510 = vmatmul.mubr.msk.f32.gmra.mrb[40].mxu1 %vm2747_vm1, %v2983_v52 }
 0x164   :  { %605 = vmatprep.mubr.f32.mxu1 %v2881_v0  ;;  %1540 = vmatmul.mubr.msk.f32.gmra.mrb[24].mxu0 %vm2747_vm1, %v2827_v1 }
 0x165   :  { %855 = vmatprep.mubr.f32.mxu0 %v2789_v38  ;;  %2357 = vmatpush3.bf16.msra.mxu0 %v2354_v45 }
 0x166   :  { %2359 = vmatprep.subr.bf16.mxu0 %v2358_v53 }
 0x167   :  { %1512 = vmatmul.mubr.msk.f32.gmra.mrb[42].mxu1 %vm2747_vm1, %v2994_v5 }
 0x168   :  { %610 = vmatprep.mubr.f32.mxu1 %v2912_v48  ;;  %1542 = vmatmul.mubr.msk.f32.gmra.mrb[26].mxu0 %vm2747_vm1, %v2851_v28 }
 0x169   :  { %860 = vmatprep.mubr.f32.mxu0 %v2783_v30  ;;  %2361 = vmatpush3.bf16.msra.mxu0 %v2358_v53 }
 0x16a   :  { %2363 = vmatprep.subr.bf16.mxu0 %v2362_v8 }
 0x16b   :  { %1514 = vmatmul.mubr.msk.f32.gmra.mrb[44].mxu1 %vm2747_vm1, %v3005_v18 }
 0x16c   :  { %615 = vmatprep.mubr.f32.mxu1 %v2906_v34  ;;  %1544 = vmatmul.mubr.msk.f32.gmra.mrb[28].mxu0 %vm2747_vm1, %v2875_v55 }
 0x16d   :  { %865 = vmatprep.mubr.f32.mxu0 %v2814_v59  ;;  %2365 = vmatpush3.bf16.msra.mxu0 %v2362_v8 }
 0x16e   :  { %2367 = vmatprep.subr.bf16.mxu0 %v2366_v20 }
 0x16f   :  { %1516 = vmatmul.mubr.msk.f32.gmra.mrb[46].mxu1 %vm2747_vm1, %v296_v33 }
 0x170   :  { %1546 = vmatmul.mubr.msk.f32.gmra.mrb[30].mxu0 %vm2747_vm1, %v2900_v26  ;;  %1169 = vmatprep.mubr.f32.mxu1 %v2741_v58  ;;  %v1091_v58 = vld [vmem:[#allocation7 + $0x410] sm:$0xff] }
 0x171   :  { %870 = vmatprep.mubr.f32.mxu0 %v2645_v15  ;;  %2369 = vmatpush3.bf16.msra.mxu0 %v2366_v20 }
 0x172   :  { %2403 = vmatprep.subr.bf16.mxu0 %v2402_v40 }
 0x173   :  { %1576 = vmatmul.mubr.msk.f32.vlgmr.msra.gmra.mrb[48].mxu1 %vm2747_vm1, %v2777_v24  ;;  %v1093_v24 = vld [vmem:[#allocation7 + $0x420] sm:$0xff] }
 0x174   :  { %871 = vmatmul.mubr.f32.gmra.mrb[32].mxu0 %v2645_v15  ;;  %1174 = vmatprep.mubr.f32.mxu1 %v2762_v19 }
 0x175   :  { %875 = vmatprep.mubr.f32.mxu0 %v2837_v21 }
 0x177   :  { %1578 = vmatmul.mubr.msk.f32.gmra.mrb[50].mxu1 %vm2747_vm1, %v2802_v43  ;;  %v1095_v43 = vld [vmem:[#allocation7 + $0x430] sm:$0xff] }
 0x178   :  { %1548 = vmatmul.mubr.msk.f32.gmra.mrb[34].mxu0 %vm2747_vm1, %v289_v12  ;;  %1179 = vmatprep.mubr.f32.mxu1 %v2756_v11  ;;  %v1092_v11 = vld [vmem:[#allocation7 + $0x418] sm:$0xff] }
 0x179   :  { %880 = vmatprep.mubr.f32.mxu0 %v2833_v10  ;;  %v2406_v19 = vpack.c.bf16 %v1092_v11, %v1091_v58 }
 0x17b   :  { %1580 = vmatmul.mubr.msk.f32.gmra.mrb[52].mxu1 %vm2747_vm1, %v2827_v1  ;;  %v1098_v1 = vld [vmem:[#allocation7 + $0x448] sm:$0xff] }
 0x17c   :  { %1550 = vmatmul.mubr.msk.f32.gmra.mrb[36].mxu0 %vm2747_vm1, %v2949_v22  ;;  %1184 = vmatprep.mubr.f32.mxu1 %v2789_v38 }
 0x17d   :  { %885 = vmatprep.mubr.f32.mxu0 %v2861_v47 }
 0x17f   :  { %1582 = vmatmul.mubr.msk.f32.gmra.mrb[54].mxu1 %vm2747_vm1, %v2851_v28  ;;  %v1099_v28 = vld [vmem:[#allocation7 + $0x450] sm:$0xff] }
 0x180   :  { %1552 = vmatmul.mubr.msk.f32.gmra.mrb[38].mxu0 %vm2747_vm1, %v2961_v35  ;;  %1189 = vmatprep.mubr.f32.mxu1 %v2783_v30  ;;  %v1094_v30 = vld [vmem:[#allocation7 + $0x428] sm:$0xff] }
 0x181   :  { %890 = vmatprep.mubr.f32.mxu0 %v2855_v36  ;;  %v2410_v38 = vpack.c.bf16 %v1094_v30, %v1093_v24 }
 0x183   :  { %1584 = vmatmul.mubr.msk.f32.gmra.mrb[56].mxu1 %vm2747_vm1, %v2875_v55  ;;  %v1101_v55 = vld [vmem:[#allocation7 + $0x460] sm:$0xff] }
 0x184   :  { %1554 = vmatmul.mubr.msk.f32.gmra.mrb[40].mxu0 %vm2747_vm1, %v2972_v4  ;;  %1194 = vmatprep.mubr.f32.mxu1 %v2814_v59  ;;  %v1096_v59 = vld [vmem:[#allocation7 + $0x438] sm:$0xff] }
 0x185   :  { %895 = vmatprep.mubr.f32.mxu0 %v2887_v17  ;;  %v2414_v63 = vpack.c.bf16 %v1096_v59, %v1095_v43 }
 0x187   :  { %1586 = vmatmul.mubr.msk.f32.gmra.mrb[58].mxu1 %vm2747_vm1, %v2900_v26  ;;  %v1103_v26 = vld [vmem:[#allocation7 + $0x470] sm:$0xff] }
 0x188   :  { %1556 = vmatmul.mubr.msk.f32.gmra.mrb[42].mxu0 %vm2747_vm1, %v2983_v52  ;;  %1199 = vmatprep.mubr.f32.mxu1 %v2808_v49 }
 0x189   :  { %900 = vmatprep.mubr.f32.mxu0 %v2881_v0 }
 0x18b   :  { %1588 = vmatmul.mubr.msk.f32.gmra.mrb[60].mxu1 %vm2747_vm1, %v288_v54  ;;  %v1104_v54 = vld [vmem:[#allocation7 + $0x478] sm:$0xff] }
 0x18c   :  { %1558 = vmatmul.mubr.msk.f32.gmra.mrb[44].mxu0 %vm2747_vm1, %v2994_v5  ;;  %1204 = vmatprep.mubr.f32.mxu1 %v2645_v15  ;;  %v2430_v21 = vpack.c.bf16 %v1104_v54, %v1103_v26 }
 0x18d   :  { %905 = vmatprep.mubr.f32.mxu0 %v2912_v48 }
 0x18f   :  { %1205 = vmatmul.mubr.f32.gmra.mrb[62].mxu1 %v2645_v15 }
 0x190   :  { %1560 = vmatmul.mubr.msk.f32.gmra.mrb[46].mxu0 %vm2747_vm1, %v3005_v18  ;;  %1209 = vmatprep.mubr.f32.mxu1 %v2833_v10 }
 0x191   :  { %2130 = vmatprep.mubr.f32.mxu0 %v2645_v15 }
 0x193   :  { %1590 = vmatmul.mubr.msk.f32.gmra.mrb[64].mxu1 %vm2747_vm1, %v2949_v22 }
 0x194   :  { %2131 = vmatmul.mubr.msk.f32.vlgmr.msra.gmra.mrb[0].mxu0 %vm362_vm2, %v330_v6  ;;  %1214 = vmatprep.mubr.f32.mxu1 %v2861_v47  ;;  %v1097_v6 = vld [vmem:[#allocation7 + $0x440] sm:$0xff] }
 0x195   :  { %2405 = vmatpush3.bf16.msra.mxu0 %v2402_v40  ;;  %2133 = vmatprep.mubr.msk.f32.mxu0 %vm362_vm2, %v2759_v13  ;;  %v2418_v10 = vpack.c.bf16 %v1098_v1, %v1097_v6 }
 0x196   :  { %2407 = vmatprep.subr.bf16.mxu0 %v2406_v19 }
 0x197   :  { %1592 = vmatmul.mubr.msk.f32.gmra.mrb[66].mxu1 %vm2747_vm1, %v2961_v35 }
 0x198   :  { %2134 = vmatmul.mubr.msk.f32.gmra.mrb[2].mxu0 %vm362_vm2, %v2780_v25  ;;  %1219 = vmatprep.mubr.f32.mxu1 %v2855_v36  ;;  %v1100_v36 = vld [vmem:[#allocation7 + $0x458] sm:$0xff] }
 0x199   :  { %2409 = vmatpush3.bf16.msra.mxu0 %v2406_v19  ;;  %2136 = vmatprep.mubr.msk.f32.mxu0 %vm362_vm2, %v2786_v32  ;;  %v2422_v47 = vpack.c.bf16 %v1100_v36, %v1099_v28 }
 0x19a   :  { %2411 = vmatprep.subr.bf16.mxu0 %v2410_v38 }
 0x19b   :  { %1594 = vmatmul.mubr.msk.f32.gmra.mrb[68].mxu1 %vm2747_vm1, %v2972_v4 }
 0x19c   :  { %2137 = vmatmul.mubr.msk.f32.gmra.mrb[4].mxu0 %vm362_vm2, %v2805_v44  ;;  %1224 = vmatprep.mubr.f32.mxu1 %v2887_v17  ;;  %v1102_v17 = vld [vmem:[#allocation7 + $0x468] sm:$0xff] }
 0x19d   :  { %2413 = vmatpush3.bf16.msra.mxu0 %v2410_v38  ;;  %2139 = vmatprep.mubr.msk.f32.mxu0 %vm362_vm2, %v2811_v51 }
 0x19e   :  { %2415 = vmatprep.subr.bf16.mxu0 %v2414_v63 }
 0x19f   :  { %1596 = vmatmul.mubr.msk.f32.gmra.mrb[70].mxu1 %vm2747_vm1, %v2983_v52 }
 0x1a0   :  { %2140 = vmatmul.mubr.msk.f32.gmra.mrb[6].mxu0 %vm362_vm2, %v2830_v2  ;;  %1229 = vmatprep.mubr.f32.mxu1 %v2881_v0  ;;  %v2426_v0 = vpack.c.bf16 %v1102_v17, %v1101_v55 }
 0x1a1   :  { %2417 = vmatpush3.bf16.msra.mxu0 %v2414_v63  ;;  %2142 = vmatprep.mubr.f32.mxu0 %v2645_v15 }
 0x1a2   :  { %2419 = vmatprep.subr.bf16.mxu0 %v2418_v10 }
 0x1a3   :  { %1598 = vmatmul.mubr.msk.f32.gmra.mrb[72].mxu1 %vm2747_vm1, %v2994_v5 }
 0x1a4   :  { %2143 = vmatmul.mubr.msk.f32.gmra.mrb[8].mxu0 %vm362_vm2, %v338_v29  ;;  %1234 = vmatprep.mubr.f32.mxu1 %v2912_v48 }
 0x1a5   :  { %2421 = vmatpush3.bf16.msra.mxu0 %v2418_v10  ;;  %2145 = vmatprep.mubr.msk.f32.mxu0 %vm362_vm2, %v2858_v39 }
 0x1a6   :  { %2423 = vmatprep.subr.bf16.mxu0 %v2422_v47 }
 0x1a7   :  { %1600 = vmatmul.mubr.msk.f32.gmra.mrb[74].mxu1 %vm2747_vm1, %v3005_v18 }
 0x1a8   :  { %2146 = vmatmul.mubr.msk.f32.gmra.mrb[10].mxu0 %vm362_vm2, %v2878_v56  ;;  %1239 = vmatprep.mubr.f32.mxu1 %v2906_v34 }
 0x1a9   :  { %2425 = vmatpush3.bf16.msra.mxu0 %v2422_v47  ;;  %2148 = vmatprep.mubr.msk.f32.mxu0 %vm362_vm2, %v2884_v7 }
 0x1aa   :  { %2427 = vmatprep.subr.bf16.mxu0 %v2426_v0 }
 0x1ab   :  { %1602 = vmatmul.mubr.msk.f32.gmra.mrb[76].mxu1 %vm2747_vm1, %v296_v33 }
 0x1ac   :  { %2149 = vmatmul.mubr.msk.f32.gmra.mrb[12].mxu0 %vm362_vm2, %v2903_v27  ;;  %1244 = vmatprep.mubr.f32.mxu1 %v2645_v15 }
 0x1ad   :  { %2429 = vmatpush3.bf16.msra.mxu0 %v2426_v0  ;;  %2151 = vmatprep.mubr.msk.f32.mxu0 %vm362_vm2, %v2909_v37 }
 0x1ae   :  { %2431 = vmatprep.subr.bf16.mxu0 %v2430_v21 }
 0x1af   :  { %1245 = vmatmul.mubr.f32.gmra.mrb[78].mxu1 %v2645_v15 }
 0x1b0   :  { %2152 = vmatmul.mubr.msk.f32.gmra.mrb[14].mxu0 %vm362_vm2, %v2926_v57 }
 0x1b1   :  { %2433 = vmatpush3.bf16.msra.mxu0 %v2430_v21  ;;  %2186 = vmatprep.mubr.msk.f32.mxu0 %vm362_vm2, %v2759_v13 }
 0x1b4   :  { %2187 = vmatmul.mubr.msk.f32.vlgmr.msra.gmra.mrb[0].mxu0 %vm362_vm2, %v2780_v25 }
 0x1b5   :  { %2189 = vmatprep.mubr.msk.f32.mxu0 %vm362_vm2, %v2786_v32 }
 0x1b8   :  { %2190 = vmatmul.mubr.msk.f32.gmra.mrb[2].mxu0 %vm362_vm2, %v2805_v44 }
 0x1b9   :  { %2192 = vmatprep.mubr.msk.f32.mxu0 %vm362_vm2, %v2811_v51 }
 0x1bc   :  { %2193 = vmatmul.mubr.msk.f32.gmra.mrb[4].mxu0 %vm362_vm2, %v2830_v2 }
 0x1bd   :  { %2195 = vmatprep.mubr.msk.f32.mxu0 %vm362_vm2, %v337_v14 }
 0x1c0   :  { %2196 = vmatmul.mubr.f32.gmra.mrb[6].mxu0 %v2645_v15 }
 0x1c1   :  { %2198 = vmatprep.mubr.msk.f32.mxu0 %vm362_vm2, %v2858_v39 }
 0x1c4   :  { %2199 = vmatmul.mubr.msk.f32.gmra.mrb[8].mxu0 %vm362_vm2, %v2878_v56 }
 0x1c5   :  { %2201 = vmatprep.mubr.msk.f32.mxu0 %vm362_vm2, %v2884_v7 }
 0x1c8   :  { %2202 = vmatmul.mubr.msk.f32.gmra.mrb[10].mxu0 %vm362_vm2, %v2903_v27 }
 0x1c9   :  { %2204 = vmatprep.mubr.msk.f32.mxu0 %vm362_vm2, %v2909_v37 }
 0x1cc   :  { %2205 = vmatmul.mubr.msk.f32.gmra.mrb[12].mxu0 %vm362_vm2, %v2926_v57 }
 0x1cd   :  { %2207 = vmatprep.mubr.msk.f32.mxu0 %vm362_vm2, %v345_v61 }
 0x1d0   :  { %2208 = vmatmul.mubr.f32.gmra.mrb[14].mxu0 %v2645_v15 }
 0x206   :  { %v1682_v3 = vpop.f32.mrb[16].mxu1 }
 0x207   :  { %v1683_v13 = vpop.f32.mrb[17].mxu1 }
 0x208   :  { %v1684_v25 = vadd.f32 %v1683_v13, %v1682_v3 }
 0x20a   :  { %v1685_v32 = vpop.f32.mrb[18].mxu1 }
 0x20b   :  { %v1686_v44 = vpop.f32.mrb[19].mxu1 }
 0x20c   :  { %v1687_v49 = vadd.f32 %v1686_v44, %v1685_v32 }
 0x20e   :  { %v1688_v51 = vpop.f32.mrb[20].mxu1 }
 0x20f   :  { %v1689_v2 = vpop.f32.mrb[21].mxu1 }
 0x210   :  { %v1690_v14 = vadd.f32 %v1689_v2, %v1688_v51 }
 0x212   :  { %v1691_v29 = vpop.f32.mrb[22].mxu1 }
 0x213   :  { %v1692_v39 = vpop.f32.mrb[23].mxu1 }
 0x214   :  { %v1693_v56 = vadd.f32 %v1692_v39, %v1691_v29 }
 0x216   :  { %v1694_v7 = vpop.f32.mrb[24].mxu1 }
 0x217   :  { %v1695_v27 = vpop.f32.mrb[25].mxu1 }
 0x218   :  { %v1696_v37 = vadd.f32 %v1695_v27, %v1694_v7 }
 0x21a   :  { %v1697_v34 = vpop.f32.mrb[26].mxu1 }
 0x21b   :  { %v1698_v48 = vpop.f32.mrb[27].mxu1 }
 0x21c   :  { %v3180_v57 = vadd.f32 %v1698_v48, %v1697_v34 }
 0x21e   :  { %v1700_v61 = vpop.f32.mrb[28].mxu1 }
 0x21f   :  { %v1701_v12 = vpop.f32.mrb[29].mxu1 }
 0x220   :  { %v3182_v15 = vadd.f32 %v1701_v12, %v1700_v61 }
 0x222   :  { %v1703_v22 = vpop.f32.mrb[30].mxu1 }
 0x223   :  { %v1704_v35 = vpop.f32.mrb[31].mxu1 }
 0x224   :  { %v3184_v41 = vadd.f32 %v1704_v35, %v1703_v22 }
 0x226   :  { %v1706_v42 = vpop.f32.mrb[32].mxu1 }
 0x227   :  { %v1707_v4 = vpop.f32.mrb[33].mxu1  ;;  %v1794_v45 = vpop.f32.mrb[16].mxu0 }
 0x228   :  { %v3186_v46 = vadd.f32 %v1707_v4, %v1706_v42  ;;  %v1795_v50 = vpop.f32.mrb[17].mxu0 }
 0x229   :  { %v1796_v52 = vadd.f32 %v1795_v50, %v1794_v45 }
 0x22a   :  { %v1709_v53 = vpop.f32.mrb[34].mxu1 }
 0x22b   :  { %2599 = shalt.err (!%p2596_p0)
}
 0x22c   :  { %s2600_s16 = scalar_lea.hbm %s3302_s5, 2048 }
 0x22d   :  { %p2601_p1 = scmp.ne.s32.totalorder %s3302_s5, %s2600_s16  ;;  %p2604_p2 = scmp.lt.u32.totalorder %s2600_s16, %s3302_s5 }
 0x22f   :  { %p2606_p3 = pnand %p2604_p2, %p2601_p1 }
 0x231   :  { %2609 = shalt.err (!%p2606_p3)
}
 0x232   :  { %1461 = dma.vmem_to_hbm [thread:$0]  %s1456_s12, 2048, %s3302_s5, [#allocation4], %s2642_s9, %s2642_s9, %s2643_s10   ;;  %v2437_v60 = vadd.f32 %v1796_v52, %v1684_v25  ;;  %v1710_v62 = vpop.f32.mrb[35].mxu1  ;;  %v1797_v5 = vpop.f32.mrb[18].mxu0 }
 0x233   :  { %v1711_v8 = vadd.f32 %v1710_v62, %v1709_v53  ;;  %v1798_v9 = vpop.f32.mrb[19].mxu0  ;;  %v1712_v18 = vpop.f32.mrb[36].mxu1 }
 0x234   :  { %v1799_v16 = vadd.f32 %v1798_v9, %v1797_v5  ;;  %v1713_v23 = vpop.f32.mrb[37].mxu1  ;;  %v1800_v31 = vpop.f32.mrb[20].mxu0 }
 0x235   :  { %v3203_v33 = vadd.f32 %v1713_v23, %v1712_v18  ;;  %v1801_v40 = vpop.f32.mrb[21].mxu0  ;;  %v1715_v11 = vpop.f32.mrb[38].mxu1 }
 0x236   :  { %v2434_v20 = vadd.f32 %v1799_v16, %v1687_v49  ;;  %v1802_v58 = vadd.f32 %v1801_v40, %v1800_v31  ;;  %v1716_v24 = vpop.f32.mrb[39].mxu1  ;;  %v1803_v30 = vpop.f32.mrb[22].mxu0 }
 0x237   :  { %v3205_v38 = vadd.f32 %v1716_v24, %v1715_v11  ;;  %v1804_v43 = vpop.f32.mrb[23].mxu0  ;;  %v1718_v63 = vpop.f32.mrb[40].mxu1 }
 0x238   :  { %v2443_v19 = vadd.f32 %v1802_v58, %v1690_v14  ;;  %v1805_v59 = vadd.f32 %v1804_v43, %v1803_v30  ;;  %v1719_v1 = vpop.f32.mrb[41].mxu1  ;;  %v1806_v10 = vpop.f32.mrb[24].mxu0 }
 0x239   :  { %v3207_v28 = vadd.f32 %v1719_v1, %v1718_v63  ;;  %v1807_v36 = vpop.f32.mrb[25].mxu0 }
 0x23a   :  { %v2440_v6 = vadd.f32 %v1805_v59, %v1693_v56  ;;  %v1808_v47 = vadd.f32 %v1807_v36, %v1806_v10  ;;  %v1721_v55 = vpop.f32.mrb[42].mxu1 }
 0x23b   :  { %v1722_v0 = vpop.f32.mrb[43].mxu1  ;;  %v1809_v26 = vpop.f32.mrb[26].mxu0 }
 0x23c   :  { %v2449_v17 = vadd.f32 %v1808_v47, %v1696_v37  ;;  %v3209_v54 = vadd.f32 %v1722_v0, %v1721_v55  ;;  %v1810_v21 = vpop.f32.mrb[27].mxu0 }
 0x23d   :  { %v1811_v3 = vadd.f32 %v1810_v21, %v1809_v26 }
 0x23e   :  { %v1724_v13 = vpop.f32.mrb[44].mxu1 }
 0x23f   :  { %v2446_v25 = vadd.f32 %v1811_v3, %v3180_v57  ;;  %v1725_v32 = vpop.f32.mrb[45].mxu1  ;;  %v1812_v44 = vpop.f32.mrb[28].mxu0 }
 0x240   :  { %v3212_v49 = vadd.f32 %v1725_v32, %v1724_v13  ;;  %v1813_v51 = vpop.f32.mrb[29].mxu0 }
 0x241   :  { %v1814_v2 = vadd.f32 %v1813_v51, %v1812_v44 }
 0x242   :  { %v1727_v14 = vpop.f32.mrb[46].mxu1 }
 0x243   :  { %v2455_v29 = vadd.f32 %v1814_v2, %v3182_v15  ;;  %v1728_v39 = vpop.f32.mrb[47].mxu1  ;;  %v1815_v56 = vpop.f32.mrb[30].mxu0 }
 0x244   :  { %v3215_v7 = vadd.f32 %v1728_v39, %v1727_v14  ;;  %v1816_v27 = vpop.f32.mrb[31].mxu0 }
 0x245   :  { %v1817_v37 = vadd.f32 %v1816_v27, %v1815_v56 }
 0x246   :  { %v1906_v34 = vpop.f32.mrb[48].mxu1 }
 0x247   :  { %v3218_v48 = vadd.f32 %v1817_v37, %v3184_v41  ;;  %v1818_v57 = vpop.f32.mrb[32].mxu0  ;;  %v1907_v61 = vpop.f32.mrb[49].mxu1 }
 0x248   :  { %v1908_v12 = vadd.f32 %v1907_v61, %v1906_v34  ;;  %v1819_v22 = vpop.f32.mrb[33].mxu0 }
 0x249   :  { %v1820_v35 = vadd.f32 %v1819_v22, %v1818_v57 }
 0x24a   :  { %v1909_v42 = vpop.f32.mrb[50].mxu1  ;;  %v3220_v4 = vadd.f32 %v2437_v60, %v1908_v12 }
 0x24b   :  { %v2461_v15 = vadd.f32 %v1820_v35, %v3186_v46  ;;  %v1821_v45 = vpop.f32.mrb[34].mxu0  ;;  %v1910_v50 = vpop.f32.mrb[51].mxu1 }
 0x24c   :  { %v1911_v52 = vadd.f32 %v1910_v50, %v1909_v42  ;;  %v1822_v53 = vpop.f32.mrb[35].mxu0 }
 0x24d   :  { %v1823_v62 = vadd.f32 %v1822_v53, %v1821_v45 }
 0x24e   :  { %v1912_v5 = vpop.f32.mrb[52].mxu1  ;;  %v3223_v9 = vadd.f32 %v2434_v20, %v1911_v52 }
 0x24f   :  { %v2458_v41 = vadd.f32 %v1823_v62, %v1711_v8  ;;  %v1824_v16 = vpop.f32.mrb[36].mxu0  ;;  %v1913_v18 = vpop.f32.mrb[53].mxu1 }
 0x250   :  { %v1914_v23 = vadd.f32 %v1913_v18, %v1912_v5  ;;  %v1825_v31 = vpop.f32.mrb[37].mxu0 }
 0x251   :  { %v1826_v40 = vadd.f32 %v1825_v31, %v1824_v16 }
 0x252   :  { %v1915_v58 = vpop.f32.mrb[54].mxu1  ;;  %v3225_v11 = vadd.f32 %v2443_v19, %v1914_v23 }
 0x253   :  { %v2467_v60 = vadd.f32 %v1826_v40, %v3203_v33  ;;  %v1827_v46 = vpop.f32.mrb[38].mxu0  ;;  %v1916_v24 = vpop.f32.mrb[55].mxu1 }
 0x254   :  { %v1917_v30 = vadd.f32 %v1916_v24, %v1915_v58  ;;  %v1828_v43 = vpop.f32.mrb[39].mxu0 }
 0x255   :  { %v1829_v59 = vadd.f32 %v1828_v43, %v1827_v46 }
 0x256   :  { %v1918_v63 = vpop.f32.mrb[56].mxu1  ;;  %v3228_v1 = vadd.f32 %v2440_v6, %v1917_v30 }
 0x257   :  { %v2464_v8 = vadd.f32 %v1829_v59, %v3205_v38  ;;  %v1830_v20 = vpop.f32.mrb[40].mxu0  ;;  %v1919_v10 = vpop.f32.mrb[57].mxu1 }
 0x258   :  { %v1920_v36 = vadd.f32 %v1919_v10, %v1918_v63  ;;  %v1831_v47 = vpop.f32.mrb[41].mxu0 }
 0x259   :  { %v1832_v55 = vadd.f32 %v1831_v47, %v1830_v20 }
 0x25a   :  { %v1921_v0 = vpop.f32.mrb[58].mxu1  ;;  %v3231_v19 = vadd.f32 %v2449_v17, %v1920_v36 }
 0x25b   :  { %v2473_v33 = vadd.f32 %v1832_v55, %v3207_v28  ;;  %v1833_v26 = vpop.f32.mrb[42].mxu0  ;;  %v1922_v21 = vpop.f32.mrb[59].mxu1 }
 0x25c   :  { %v1923_v3 = vadd.f32 %v1922_v21, %v1921_v0  ;;  %v1834_v13 = vpop.f32.mrb[43].mxu0 }
 0x25d   :  { %v1835_v32 = vadd.f32 %v1834_v13, %v1833_v26 }
 0x25e   :  { %v1924_v44 = vpop.f32.mrb[60].mxu1  ;;  %v3234_v6 = vadd.f32 %v2446_v25, %v1923_v3 }
 0x25f   :  { %v2470_v38 = vadd.f32 %v1835_v32, %v3209_v54  ;;  %v1836_v51 = vpop.f32.mrb[44].mxu0  ;;  %v1925_v2 = vpop.f32.mrb[61].mxu1 }
 0x260   :  { %v1926_v14 = vadd.f32 %v1925_v2, %v1924_v44  ;;  %v1837_v39 = vpop.f32.mrb[45].mxu0 }
 0x261   :  { %v1838_v56 = vadd.f32 %v1837_v39, %v1836_v51 }
 0x262   :  { %v1927_v27 = vpop.f32.mrb[62].mxu1  ;;  %v3237_v17 = vadd.f32 %v2455_v29, %v1926_v14 }
 0x263   :  { %v2479_v28 = vadd.f32 %v1838_v56, %v3212_v49  ;;  %v1839_v37 = vpop.f32.mrb[46].mxu0  ;;  %v1928_v34 = vpop.f32.mrb[63].mxu1 }
 0x264   :  { %v1929_v57 = vadd.f32 %v1928_v34, %v1927_v27  ;;  %v1840_v61 = vpop.f32.mrb[47].mxu0 }
 0x265   :  { %v1841_v12 = vadd.f32 %v1840_v61, %v1839_v37 }
 0x266   :  { %v1930_v22 = vpop.f32.mrb[64].mxu1  ;;  %v2453_v25 = vadd.f32 %v3218_v48, %v1929_v57 }
 0x267   :  { %v2476_v54 = vadd.f32 %v1841_v12, %v3215_v7  ;;  %v1931_v35 = vpop.f32.mrb[65].mxu1 }
 0x268   :  { %v1932_v42 = vadd.f32 %v1931_v35, %v1930_v22 }
 0x26a   :  { %v1933_v45 = vpop.f32.mrb[66].mxu1  ;;  %v3242_v50 = vadd.f32 %v2461_v15, %v1932_v42 }
 0x26b   :  { %v1934_v52 = vpop.f32.mrb[67].mxu1 }
 0x26c   :  { %v1935_v29 = vadd.f32 %v1934_v52, %v1933_v45 }
 0x26e   :  { %v1936_v53 = vpop.f32.mrb[68].mxu1  ;;  %v2459_v62 = vadd.f32 %v2458_v41, %v1935_v29 }
 0x26f   :  { %v1937_v49 = vpop.f32.mrb[69].mxu1 }
 0x270   :  { %v1938_v5 = vadd.f32 %v1937_v49, %v1936_v53 }
 0x272   :  { %v1939_v16 = vpop.f32.mrb[70].mxu1  ;;  %v3244_v18 = vadd.f32 %v2467_v60, %v1938_v5 }
 0x273   :  { %v1940_v23 = vpop.f32.mrb[71].mxu1 }
 0x274   :  { %v1941_v31 = vadd.f32 %v1940_v23, %v1939_v16 }
 0x276   :  { %v1942_v40 = vpop.f32.mrb[72].mxu1  ;;  %v2465_v48 = vadd.f32 %v2464_v8, %v1941_v31  ;;  %v3253_v8 = vld [vmem:[%s3301_s4] ss:$0 sm:$0xff]  ;;  %s2647_s4 = smov [#allocation9]  }
 0x277   :  { %v1943_v58 = vpop.f32.mrb[73].mxu1  ;;  %s1467_s23 = sshll.u32 %s2647_s4, 4  ;;  %s1468_s23 = int_to_ptr.vmem [resolvable:$true] %s1467_s23 }
 0x278   :  { %v1944_v7 = vadd.f32 %v1943_v58, %v1942_v40  ;;  %s2610_s25 = scalar_lea.vmem %s1468_s23, 2048  ;;  %p2615_p5 = scmp.lt.s32.totalorder %s1468_s23, %s1468_s23 }
 0x279   :  { %p2611_p4 = scmp.ne.s32.totalorder %s1468_s23, %s2610_s25  ;;  %p2616_p6 = scmp.lt.s32.totalorder %s2610_s25, %s2610_s25 }
 0x27a   :  { %v1945_v46 = vpop.f32.mrb[74].mxu1  ;;  %v3246_v24 = vadd.f32 %v2473_v33, %v1944_v7 }
 0x27b   :  { %v1946_v15 = vpop.f32.mrb[75].mxu1  ;;  %p2617_p7 = por %p2616_p6, %p2615_p5 }
 0x27c   :  { %v1947_v30 = vadd.f32 %v1946_v15, %v1945_v46 }
 0x27d   :  { %p2618_p8 = pnand %p2617_p7, %p2611_p4 }
 0x27e   :  { %v1948_v43 = vpop.f32.mrb[76].mxu1  ;;  %v2471_v59 = vadd.f32 %v2470_v38, %v1947_v30 }
 0x27f   :  { %v1949_v63 = vpop.f32.mrb[77].mxu1 }
 0x280   :  { %v1950_v41 = vadd.f32 %v1949_v63, %v1948_v43 }
 0x282   :  { %v1951_v20 = vpop.f32.mrb[78].mxu1  ;;  %v3248_v10 = vadd.f32 %v2479_v28, %v1950_v41 }
 0x283   :  { %v1952_v60 = vpop.f32.mrb[79].mxu1 }
 0x284   :  { %v1953_v36 = vadd.f32 %v1952_v60, %v1951_v20 }
 0x286   :  { %v2477_v47 = vadd.f32 %v2476_v54, %v1953_v36 }
 0x287   :  { %v2188_v55 = vpop.f32.mrb[0].mxu0 }
 0x288   :  { %v2436_v0 = vadd.f32 %v3223_v9, %v2188_v55  ;;  %v1316_v33 = vpop.f32.mrb[1].mxu0 }
 0x289   :  { %v2439_v26 = vadd.f32 %v3220_v4, %v1316_v33 }
 0x28a   :  { %v1419_v21 = vadd.f32 %v2436_v0, %v3253_v8 }
 0x28b   :  { %v1418_v3 = vadd.f32 %v2439_v26, %v3253_v8  ;;  %v2191_v13 = vpop.f32.mrb[2].mxu0 }
 0x28c   :  { %1435 = vst [vmem:[#allocation9 + $0x8] sm:$0xff] %v1419_v21  ;;  %v2442_v32 = vadd.f32 %v3228_v1, %v2191_v13  ;;  %v1326_v44 = vpop.f32.mrb[3].mxu0 }
 0x28d   :  { %1434 = vst [vmem:[#allocation9] sm:$0xff] %v1418_v3  ;;  %v2445_v38 = vadd.f32 %v3225_v11, %v1326_v44 }
 0x28e   :  { %v1421_v51 = vadd.f32 %v2442_v32, %v3253_v8 }
 0x28f   :  { %v1420_v2 = vadd.f32 %v2445_v38, %v3253_v8  ;;  %v2194_v9 = vpop.f32.mrb[4].mxu0 }
 0x290   :  { %1437 = vst [vmem:[#allocation9 + $0x18] sm:$0xff] %v1421_v51  ;;  %v2448_v4 = vadd.f32 %v3234_v6, %v2194_v9  ;;  %v1336_v14 = vpop.f32.mrb[5].mxu0 }
 0x291   :  { %1436 = vst [vmem:[#allocation9 + $0x10] sm:$0xff] %v1420_v2  ;;  %v2451_v39 = vadd.f32 %v3231_v19, %v1336_v14 }
 0x292   :  { %v1423_v56 = vadd.f32 %v2448_v4, %v3253_v8 }
 0x293   :  { %v1422_v1 = vadd.f32 %v2451_v39, %v3253_v8  ;;  %v2197_v27 = vpop.f32.mrb[6].mxu0 }
 0x294   :  { %1439 = vst [vmem:[#allocation9 + $0x28] sm:$0xff] %v1423_v56  ;;  %v2454_v28 = vadd.f32 %v2453_v25, %v2197_v27  ;;  %v1346_v11 = vpop.f32.mrb[7].mxu0 }
 0x295   :  { %1438 = vst [vmem:[#allocation9 + $0x20] sm:$0xff] %v1422_v1  ;;  %v2457_v37 = vadd.f32 %v3237_v17, %v1346_v11 }
 0x296   :  { %v1425_v34 = vadd.f32 %v2454_v28, %v3253_v8 }
 0x297   :  { %v1424_v57 = vadd.f32 %v2457_v37, %v3253_v8  ;;  %v2200_v6 = vpop.f32.mrb[8].mxu0 }
 0x298   :  { %1441 = vst [vmem:[#allocation9 + $0x38] sm:$0xff] %v1425_v34  ;;  %v2460_v61 = vadd.f32 %v2459_v62, %v2200_v6  ;;  %v1356_v12 = vpop.f32.mrb[9].mxu0 }
 0x299   :  { %1440 = vst [vmem:[#allocation9 + $0x30] sm:$0xff] %v1424_v57  ;;  %v2463_v19 = vadd.f32 %v3242_v50, %v1356_v12 }
 0x29a   :  { %v1427_v22 = vadd.f32 %v2460_v61, %v3253_v8 }
 0x29b   :  { %v1426_v54 = vadd.f32 %v2463_v19, %v3253_v8  ;;  %v2203_v25 = vpop.f32.mrb[10].mxu0 }
 0x29c   :  { %1443 = vst [vmem:[#allocation9 + $0x48] sm:$0xff] %v1427_v22  ;;  %v2466_v35 = vadd.f32 %v2465_v48, %v2203_v25  ;;  %v1366_v42 = vpop.f32.mrb[11].mxu0 }
 0x29d   :  { %1442 = vst [vmem:[#allocation9 + $0x40] sm:$0xff] %v1426_v54  ;;  %v2469_v17 = vadd.f32 %v3244_v18, %v1366_v42 }
 0x29e   :  { %v1429_v45 = vadd.f32 %v2466_v35, %v3253_v8 }
 0x29f   :  { %v1428_v52 = vadd.f32 %v2469_v17, %v3253_v8  ;;  %v2206_v29 = vpop.f32.mrb[12].mxu0 }
 0x2a0   :  { %1445 = vst [vmem:[#allocation9 + $0x58] sm:$0xff] %v1429_v45  ;;  %v2472_v53 = vadd.f32 %v2471_v59, %v2206_v29  ;;  %v1376_v62 = vpop.f32.mrb[13].mxu0 }
 0x2a1   :  { %1444 = vst [vmem:[#allocation9 + $0x50] sm:$0xff] %v1428_v52  ;;  %v2475_v50 = vadd.f32 %v3246_v24, %v1376_v62 }
 0x2a2   :  { %v1431_v49 = vadd.f32 %v2472_v53, %v3253_v8 }
 0x2a3   :  { %v1430_v5 = vadd.f32 %v2475_v50, %v3253_v8  ;;  %v2209_v16 = vpop.f32.mrb[14].mxu0 }
 0x2a4   :  { %1447 = vst [vmem:[#allocation9 + $0x68] sm:$0xff] %v1431_v49  ;;  %v2478_v23 = vadd.f32 %v2477_v47, %v2209_v16  ;;  %v1386_v31 = vpop.f32.mrb[15].mxu0 }
 0x2a5   :  { %1446 = vst [vmem:[#allocation9 + $0x60] sm:$0xff] %v1430_v5  ;;  %v2481_v18 = vadd.f32 %v3248_v10, %v1386_v31 }
 0x2a6   :  { %v1433_v40 = vadd.f32 %v2478_v23, %v3253_v8 }
 0x2a7   :  { %v1432_v48 = vadd.f32 %v2481_v18, %v3253_v8 }
 0x2a8   :  { %1449 = vst [vmem:[#allocation9 + $0x78] sm:$0xff] %v1433_v40 }
 0x2a9   :  { %1448 = vst [vmem:[#allocation9 + $0x70] sm:$0xff] %v1432_v48 }
 0x2aa   :  { %2621 = shalt.err (!%p2618_p8)
}
 0x2ab   :  { %s2622_s28 = scalar_lea.hbm %s3303_s6, 2048 }
 0x2ac   :  { %p2623_p9 = scmp.ne.s32.totalorder %s3303_s6, %s2622_s28  ;;  %p2626_p10 = scmp.lt.u32.totalorder %s2622_s28, %s3303_s6 }
 0x2ae   :  { %p2628_p11 = pnand %p2626_p10, %p2623_p9 }
 0x2b0   :  { %2631 = shalt.err (!%p2628_p11)
}
 0x2b1   :  { %1473 = dma.vmem_to_hbm [thread:$0]  %s1468_s23, 2048, %s3303_s6, [#allocation10], %s2642_s9, %s2642_s9, %s2643_s10  }
 0x2b2   :  { %2636 = dma.done.wait [#allocation4], 2048  }
 0x2b3   :  { %2637 = vsyncadd [#allocation4], 4294965248 }
 0x2b4   :  { %2638 = dma.done.wait [#allocation10], 2048  }
 0x2b5   :  { %2639 = vsyncadd [#allocation10], 4294965248 }
 0x2b6   :  { %1480 = vsyncpa [#allocation3], 1 }
 0x2b7   :  { %1481 = vsyncpa [#allocation6], 1 }
 0x2b8   :  { %1482 = vsyncpa [#allocation4], 1 }
 0x2b9   :  { %1483 = vsyncpa [#allocation10], 1 }

</bundles_post_ra>
